<compile_context>
chip_gen: v5e
topology: v5e:2x2
jax: 0.10.0
libtpu: 0.0.40
codegen_flags: <defaults>
</compile_context>

<pallas_src>
import functools
import math

import jax
import jax.numpy as jnp
from jax.experimental import pallas as pl
from jax.experimental.pallas import tpu as pltpu


# --------------------------------------------------------------------------
# Parameter setup (matches torch gkern2d exactly, incl. the -l//2 floor-div)
# --------------------------------------------------------------------------
def gkern2d(k=7, sig=3.0):
    """jnp version (used by the pure-JAX reference)."""
    ax = jnp.arange(-k // 2 + 1.0, k // 2 + 1.0, dtype=jnp.float32)
    xx, yy = jnp.meshgrid(ax, ax, indexing="ij")
    return jnp.exp(-(xx ** 2 + yy ** 2) / (2.0 * sig ** 2))


def _gauss_weights_py(k, sig):
    """Pure-Python flattened Gaussian weights (compile-time constants).

    Flat index j = y*k + x matches both gw.reshape(k*k) (row-major) and the
    Shift module's (y outer, x inner) slice/concat order.
    """
    ax = [(-k) // 2 + 1 + i for i in range(k)]
    return tuple(
        math.exp(-(ax[y] ** 2 + ax[x] ** 2) / (2.0 * sig ** 2))
        for y in range(k) for x in range(k)
    )


def _pick_tile_h(H, max_tile=512):
    """Largest row tile: whole image if small, else a multiple-of-8 divisor."""
    if H <= max_tile:
        return H
    t = max_tile - (max_tile % 8)
    while t >= 8:
        if H % t == 0:
            return t
        t -= 8
    return H  # no nice divisor -> single step over the whole height


# --------------------------------------------------------------------------
# Pallas kernel: one grid step per output row tile; k*k shifts unrolled inside
# --------------------------------------------------------------------------
def _bilateral_kernel(xpad_ref, out_ref, *, k, pad, tile_h, weights,
                      neg_inv_sigma):
    # xpad_ref : (H + 2p, W + 2p)  zero-padded image, resident in VMEM
    # out_ref  : (tile_h, W)       output row tile
    w_out = out_ref.shape[-1]

    row0 = pl.program_id(0) * tile_h
    if tile_h % 8 == 0:
        row0 = pl.multiple_of(row0, 8)

    # Center pixel values I(x) for this row tile: x_pad[row0+p : .., p:p+W]
    center = xpad_ref[pl.ds(row0 + pad, tile_h), pl.ds(pad, w_out)]

    num = None
    den = None
    # Fully unrolled shift loop: dy -> sublane offset, dx -> lane offset.
    for dy in range(k):
        for dx in range(k):
            wgt = weights[dy * k + dx]                 # compile-time scalar
            sh = xpad_ref[pl.ds(row0 + dy, tile_h), pl.ds(dx, w_out)]
            d = sh - center
            dd = jnp.exp(d * d * neg_inv_sigma) * wgt  # range * spatial weight
            if num is None:                            # first shift: init
                num = dd * sh
                den = dd
            else:
                num = num + dd * sh
                den = den + dd

    out_ref[...] = (num / den).astype(out_ref.dtype)


# --------------------------------------------------------------------------
# Wrapper: zero-pad (the Shift module's F.pad) + pallas_call
# --------------------------------------------------------------------------
def bilateral_filter(I, k=7, sigma_space=10.0, sigma_color=0.1):
    C, H, W = I.shape
    # torch's Iex = I.expand(Is.size()) only works when channels == 1, so the
    # reference module is only well-defined for a single channel.
    assert C == 1, "reference module is only consistent for channels == 1"
    p = (k - 1) // 2                                   # pad: 1/2/3 for k=3/5/7

    x = I[0].astype(jnp.float32)
    x_pad = jnp.pad(x, ((p, p), (p, p)))               # (H+2p, W+2p), zero pad
    Hp, Wp = H + 2 * p, W + 2 * p

    weights = _gauss_weights_py(k, sigma_space)        # k*k python floats
    neg_inv_sigma = -1.0 / (2.0 * sigma_color ** 2)

    tile_h = _pick_tile_h(H)                           # biggest tile that divides H
    grid = (H // tile_h,)

    kernel = functools.partial(
        _bilateral_kernel,
        k=k, pad=p, tile_h=tile_h,
        weights=weights, neg_inv_sigma=neg_inv_sigma,
    )

    out = pl.pallas_call(
        kernel,
        out_shape=jax.ShapeDtypeStruct((H, W), jnp.float32),
        grid_spec=pltpu.PrefetchScalarGridSpec(
            num_scalar_prefetch=0,
            grid=grid,
            in_specs=[
                # Full padded image, constant block index -> fetched once,
                # stays resident in VMEM across all row tiles.
                pl.BlockSpec((Hp, Wp), lambda i: (0, 0)),
            ],
            out_specs=pl.BlockSpec((tile_h, W), lambda i: (i, 0)),
        ),
        compiler_params=pltpu.CompilerParams(
            dimension_semantics=("parallel",),         # independent row tiles
            vmem_limit_bytes=64 * 1024 * 1024,
        ),
    )(x_pad)

    return out[None]                                   # (1, H, W), as in torch


# --------------------------------------------------------------------------
# Pure-JAX reference (mirrors the PyTorch forward 1:1)
# --------------------------------------------------------------------------
def bilateral_filter_ref(I, k=7, sigma_space=10.0, sigma_color=0.1):
    C, H, W = I.shape
    p = (k - 1) // 2
    KK = k * k
    gw = gkern2d(k, sigma_space)
    g = jnp.broadcast_to(gw.reshape(1, KK, 1, 1), (1, KK, H, W))
    x_pad = jnp.pad(I[0], ((p, p), (p, p)))
    Is = jnp.stack(
        [x_pad[y:y + H, x:x + W] for y in range(k) for x in range(k)], axis=0)
    Iex = jnp.broadcast_to(I, Is.shape)
    D = (Is - Iex) ** 2
    De = jnp.exp(-D / (2.0 * sigma_color ** 2))
    Dd = De * g                                        # (1, KK, H, W)
    W_denom = jnp.sum(Dd, axis=1)                      # (1, H, W)
    If = jnp.sum(Dd * Is, axis=1) / W_denom            # (1, H, W)
    return If


if __name__ == "__main__":
    key = jax.random.PRNGKey(0)
    H = Wd = 16
    k = 7
    # image-like input in [0, 1] so sigma_color=0.1 is meaningful
    I = jax.random.uniform(key, (1, H, Wd), dtype=jnp.float32)

    out = bilateral_filter(I, k=k, sigma_space=10.0, sigma_color=0.1)
    out = jax.block_until_ready(out)

    ref = bilateral_filter_ref(I, k=k, sigma_space=10.0, sigma_color=0.1)
    assert out.shape == (1, H, Wd), out.shape
    assert jnp.allclose(out, ref, atol=1e-5, rtol=1e-5), float(
        jnp.max(jnp.abs(out - ref)))

    print("KERNEL_OK")
</pallas_src>

<mosaic_0001>
module attributes {stable_mosaic.version = 11 : i64} {
  func.func @_bilateral_kernel(%arg0: i32, %arg1: memref<22x22xf32, #tpu.memory_space<vmem>>, %arg2: memref<16x16xf32, #tpu.memory_space<vmem>>) attributes {dimension_semantics = [#tpu.dimension_semantics<parallel>], iteration_bounds = array<i64: 1>, scalar_prefetch = 0 : i64, scratch_operands = 0 : i64, tpu.core_type = #tpu.core_type<tc>, window_params = [{pipeline_mode = #tpu.pipeline_mode<synchronous>, transform_indices = @transform_0, window_bounds = array<i64: 22, 22>}, {transform_indices = @transform_1, window_bounds = array<i64: 16, 16>}]} {
    %c16_i32 = arith.constant 16 : i32
    %0 = arith.muli %arg0, %c16_i32 : i32
    %1 = tpu.assume_multiple %0, 8 : i32
    %c3_i32 = arith.constant 3 : i32
    %2 = arith.addi %1, %c3_i32 : i32
    %3 = arith.index_cast %2 : i32 to index
    %c3 = arith.constant 3 : index
    %4 = vector.load %arg1[%3, %c3] : memref<22x22xf32, #tpu.memory_space<vmem>>, vector<16x16xf32>
    %c0_i32 = arith.constant 0 : i32
    %5 = arith.addi %1, %c0_i32 : i32
    %6 = arith.index_cast %5 : i32 to index
    %c0 = arith.constant 0 : index
    %7 = vector.load %arg1[%6, %c0] : memref<22x22xf32, #tpu.memory_space<vmem>>, vector<16x16xf32>
    %8 = arith.subf %7, %4 : vector<16x16xf32>
    %9 = arith.mulf %8, %8 : vector<16x16xf32>
    %cst = arith.constant -5.000000e+01 : f32
    %10 = vector.broadcast %cst : f32 to vector<16x16xf32>
    %11 = arith.mulf %9, %10 : vector<16x16xf32>
    %12 = math.exp %11 : vector<16x16xf32>
    %cst_0 = arith.constant 0.91393119 : f32
    %13 = vector.broadcast %cst_0 : f32 to vector<16x16xf32>
    %14 = arith.mulf %12, %13 : vector<16x16xf32>
    %15 = arith.mulf %14, %7 : vector<16x16xf32>
    %c0_i32_1 = arith.constant 0 : i32
    %16 = arith.addi %1, %c0_i32_1 : i32
    %17 = arith.index_cast %16 : i32 to index
    %c1 = arith.constant 1 : index
    %18 = vector.load %arg1[%17, %c1] : memref<22x22xf32, #tpu.memory_space<vmem>>, vector<16x16xf32>
    %19 = arith.subf %18, %4 : vector<16x16xf32>
    %20 = arith.mulf %19, %19 : vector<16x16xf32>
    %cst_2 = arith.constant -5.000000e+01 : f32
    %21 = vector.broadcast %cst_2 : f32 to vector<16x16xf32>
    %22 = arith.mulf %20, %21 : vector<16x16xf32>
    %23 = math.exp %22 : vector<16x16xf32>
    %cst_3 = arith.constant 0.937067449 : f32
    %24 = vector.broadcast %cst_3 : f32 to vector<16x16xf32>
    %25 = arith.mulf %23, %24 : vector<16x16xf32>
    %26 = arith.mulf %25, %18 : vector<16x16xf32>
    %27 = arith.addf %15, %26 : vector<16x16xf32>
    %28 = arith.addf %14, %25 : vector<16x16xf32>
    %c0_i32_4 = arith.constant 0 : i32
    %29 = arith.addi %1, %c0_i32_4 : i32
    %30 = arith.index_cast %29 : i32 to index
    %c2 = arith.constant 2 : index
    %31 = vector.load %arg1[%30, %c2] : memref<22x22xf32, #tpu.memory_space<vmem>>, vector<16x16xf32>
    %32 = arith.subf %31, %4 : vector<16x16xf32>
    %33 = arith.mulf %32, %32 : vector<16x16xf32>
    %cst_5 = arith.constant -5.000000e+01 : f32
    %34 = vector.broadcast %cst_5 : f32 to vector<16x16xf32>
    %35 = arith.mulf %33, %34 : vector<16x16xf32>
    %36 = math.exp %35 : vector<16x16xf32>
    %cst_6 = arith.constant 0.951229453 : f32
    %37 = vector.broadcast %cst_6 : f32 to vector<16x16xf32>
    %38 = arith.mulf %36, %37 : vector<16x16xf32>
    %39 = arith.mulf %38, %31 : vector<16x16xf32>
    %40 = arith.addf %27, %39 : vector<16x16xf32>
    %41 = arith.addf %28, %38 : vector<16x16xf32>
    %c0_i32_7 = arith.constant 0 : i32
    %42 = arith.addi %1, %c0_i32_7 : i32
    %43 = arith.index_cast %42 : i32 to index
    %c3_8 = arith.constant 3 : index
    %44 = vector.load %arg1[%43, %c3_8] : memref<22x22xf32, #tpu.memory_space<vmem>>, vector<16x16xf32>
    %45 = arith.subf %44, %4 : vector<16x16xf32>
    %46 = arith.mulf %45, %45 : vector<16x16xf32>
    %cst_9 = arith.constant -5.000000e+01 : f32
    %47 = vector.broadcast %cst_9 : f32 to vector<16x16xf32>
    %48 = arith.mulf %46, %47 : vector<16x16xf32>
    %49 = math.exp %48 : vector<16x16xf32>
    %cst_10 = arith.constant 0.955997467 : f32
    %50 = vector.broadcast %cst_10 : f32 to vector<16x16xf32>
    %51 = arith.mulf %49, %50 : vector<16x16xf32>
    %52 = arith.mulf %51, %44 : vector<16x16xf32>
    %53 = arith.addf %40, %52 : vector<16x16xf32>
    %54 = arith.addf %41, %51 : vector<16x16xf32>
    %c0_i32_11 = arith.constant 0 : i32
    %55 = arith.addi %1, %c0_i32_11 : i32
    %56 = arith.index_cast %55 : i32 to index
    %c4 = arith.constant 4 : index
    %57 = vector.load %arg1[%56, %c4] : memref<22x22xf32, #tpu.memory_space<vmem>>, vector<16x16xf32>
    %58 = arith.subf %57, %4 : vector<16x16xf32>
    %59 = arith.mulf %58, %58 : vector<16x16xf32>
    %cst_12 = arith.constant -5.000000e+01 : f32
    %60 = vector.broadcast %cst_12 : f32 to vector<16x16xf32>
    %61 = arith.mulf %59, %60 : vector<16x16xf32>
    %62 = math.exp %61 : vector<16x16xf32>
    %cst_13 = arith.constant 0.951229453 : f32
    %63 = vector.broadcast %cst_13 : f32 to vector<16x16xf32>
    %64 = arith.mulf %62, %63 : vector<16x16xf32>
    %65 = arith.mulf %64, %57 : vector<16x16xf32>
    %66 = arith.addf %53, %65 : vector<16x16xf32>
    %67 = arith.addf %54, %64 : vector<16x16xf32>
    %c0_i32_14 = arith.constant 0 : i32
    %68 = arith.addi %1, %c0_i32_14 : i32
    %69 = arith.index_cast %68 : i32 to index
    %c5 = arith.constant 5 : index
    %70 = vector.load %arg1[%69, %c5] : memref<22x22xf32, #tpu.memory_space<vmem>>, vector<16x16xf32>
    %71 = arith.subf %70, %4 : vector<16x16xf32>
    %72 = arith.mulf %71, %71 : vector<16x16xf32>
    %cst_15 = arith.constant -5.000000e+01 : f32
    %73 = vector.broadcast %cst_15 : f32 to vector<16x16xf32>
    %74 = arith.mulf %72, %73 : vector<16x16xf32>
    %75 = math.exp %74 : vector<16x16xf32>
    %cst_16 = arith.constant 0.937067449 : f32
    %76 = vector.broadcast %cst_16 : f32 to vector<16x16xf32>
    %77 = arith.mulf %75, %76 : vector<16x16xf32>
    %78 = arith.mulf %77, %70 : vector<16x16xf32>
    %79 = arith.addf %66, %78 : vector<16x16xf32>
    %80 = arith.addf %67, %77 : vector<16x16xf32>
    %c0_i32_17 = arith.constant 0 : i32
    %81 = arith.addi %1, %c0_i32_17 : i32
    %82 = arith.index_cast %81 : i32 to index
    %c6 = arith.constant 6 : index
    %83 = vector.load %arg1[%82, %c6] : memref<22x22xf32, #tpu.memory_space<vmem>>, vector<16x16xf32>
    %84 = arith.subf %83, %4 : vector<16x16xf32>
    %85 = arith.mulf %84, %84 : vector<16x16xf32>
    %cst_18 = arith.constant -5.000000e+01 : f32
    %86 = vector.broadcast %cst_18 : f32 to vector<16x16xf32>
    %87 = arith.mulf %85, %86 : vector<16x16xf32>
    %88 = math.exp %87 : vector<16x16xf32>
    %cst_19 = arith.constant 0.91393119 : f32
    %89 = vector.broadcast %cst_19 : f32 to vector<16x16xf32>
    %90 = arith.mulf %88, %89 : vector<16x16xf32>
    %91 = arith.mulf %90, %83 : vector<16x16xf32>
    %92 = arith.addf %79, %91 : vector<16x16xf32>
    %93 = arith.addf %80, %90 : vector<16x16xf32>
    %c1_i32 = arith.constant 1 : i32
    %94 = arith.addi %1, %c1_i32 : i32
    %95 = arith.index_cast %94 : i32 to index
    %c0_20 = arith.constant 0 : index
    %96 = vector.load %arg1[%95, %c0_20] : memref<22x22xf32, #tpu.memory_space<vmem>>, vector<16x16xf32>
    %97 = arith.subf %96, %4 : vector<16x16xf32>
    %98 = arith.mulf %97, %97 : vector<16x16xf32>
    %cst_21 = arith.constant -5.000000e+01 : f32
    %99 = vector.broadcast %cst_21 : f32 to vector<16x16xf32>
    %100 = arith.mulf %98, %99 : vector<16x16xf32>
    %101 = math.exp %100 : vector<16x16xf32>
    %cst_22 = arith.constant 0.937067449 : f32
    %102 = vector.broadcast %cst_22 : f32 to vector<16x16xf32>
    %103 = arith.mulf %101, %102 : vector<16x16xf32>
    %104 = arith.mulf %103, %96 : vector<16x16xf32>
    %105 = arith.addf %92, %104 : vector<16x16xf32>
    %106 = arith.addf %93, %103 : vector<16x16xf32>
    %c1_i32_23 = arith.constant 1 : i32
    %107 = arith.addi %1, %c1_i32_23 : i32
    %108 = arith.index_cast %107 : i32 to index
    %c1_24 = arith.constant 1 : index
    %109 = vector.load %arg1[%108, %c1_24] : memref<22x22xf32, #tpu.memory_space<vmem>>, vector<16x16xf32>
    %110 = arith.subf %109, %4 : vector<16x16xf32>
    %111 = arith.mulf %110, %110 : vector<16x16xf32>
    %cst_25 = arith.constant -5.000000e+01 : f32
    %112 = vector.broadcast %cst_25 : f32 to vector<16x16xf32>
    %113 = arith.mulf %111, %112 : vector<16x16xf32>
    %114 = math.exp %113 : vector<16x16xf32>
    %cst_26 = arith.constant 0.960789442 : f32
    %115 = vector.broadcast %cst_26 : f32 to vector<16x16xf32>
    %116 = arith.mulf %114, %115 : vector<16x16xf32>
    %117 = arith.mulf %116, %109 : vector<16x16xf32>
    %118 = arith.addf %105, %117 : vector<16x16xf32>
    %119 = arith.addf %106, %116 : vector<16x16xf32>
    %c1_i32_27 = arith.constant 1 : i32
    %120 = arith.addi %1, %c1_i32_27 : i32
    %121 = arith.index_cast %120 : i32 to index
    %c2_28 = arith.constant 2 : index
    %122 = vector.load %arg1[%121, %c2_28] : memref<22x22xf32, #tpu.memory_space<vmem>>, vector<16x16xf32>
    %123 = arith.subf %122, %4 : vector<16x16xf32>
    %124 = arith.mulf %123, %123 : vector<16x16xf32>
    %cst_29 = arith.constant -5.000000e+01 : f32
    %125 = vector.broadcast %cst_29 : f32 to vector<16x16xf32>
    %126 = arith.mulf %124, %125 : vector<16x16xf32>
    %127 = math.exp %126 : vector<16x16xf32>
    %cst_30 = arith.constant 0.975309908 : f32
    %128 = vector.broadcast %cst_30 : f32 to vector<16x16xf32>
    %129 = arith.mulf %127, %128 : vector<16x16xf32>
    %130 = arith.mulf %129, %122 : vector<16x16xf32>
    %131 = arith.addf %118, %130 : vector<16x16xf32>
    %132 = arith.addf %119, %129 : vector<16x16xf32>
    %c1_i32_31 = arith.constant 1 : i32
    %133 = arith.addi %1, %c1_i32_31 : i32
    %134 = arith.index_cast %133 : i32 to index
    %c3_32 = arith.constant 3 : index
    %135 = vector.load %arg1[%134, %c3_32] : memref<22x22xf32, #tpu.memory_space<vmem>>, vector<16x16xf32>
    %136 = arith.subf %135, %4 : vector<16x16xf32>
    %137 = arith.mulf %136, %136 : vector<16x16xf32>
    %cst_33 = arith.constant -5.000000e+01 : f32
    %138 = vector.broadcast %cst_33 : f32 to vector<16x16xf32>
    %139 = arith.mulf %137, %138 : vector<16x16xf32>
    %140 = math.exp %139 : vector<16x16xf32>
    %cst_34 = arith.constant 0.980198681 : f32
    %141 = vector.broadcast %cst_34 : f32 to vector<16x16xf32>
    %142 = arith.mulf %140, %141 : vector<16x16xf32>
    %143 = arith.mulf %142, %135 : vector<16x16xf32>
    %144 = arith.addf %131, %143 : vector<16x16xf32>
    %145 = arith.addf %132, %142 : vector<16x16xf32>
    %c1_i32_35 = arith.constant 1 : i32
    %146 = arith.addi %1, %c1_i32_35 : i32
    %147 = arith.index_cast %146 : i32 to index
    %c4_36 = arith.constant 4 : index
    %148 = vector.load %arg1[%147, %c4_36] : memref<22x22xf32, #tpu.memory_space<vmem>>, vector<16x16xf32>
    %149 = arith.subf %148, %4 : vector<16x16xf32>
    %150 = arith.mulf %149, %149 : vector<16x16xf32>
    %cst_37 = arith.constant -5.000000e+01 : f32
    %151 = vector.broadcast %cst_37 : f32 to vector<16x16xf32>
    %152 = arith.mulf %150, %151 : vector<16x16xf32>
    %153 = math.exp %152 : vector<16x16xf32>
    %cst_38 = arith.constant 0.975309908 : f32
    %154 = vector.broadcast %cst_38 : f32 to vector<16x16xf32>
    %155 = arith.mulf %153, %154 : vector<16x16xf32>
    %156 = arith.mulf %155, %148 : vector<16x16xf32>
    %157 = arith.addf %144, %156 : vector<16x16xf32>
    %158 = arith.addf %145, %155 : vector<16x16xf32>
    %c1_i32_39 = arith.constant 1 : i32
    %159 = arith.addi %1, %c1_i32_39 : i32
    %160 = arith.index_cast %159 : i32 to index
    %c5_40 = arith.constant 5 : index
    %161 = vector.load %arg1[%160, %c5_40] : memref<22x22xf32, #tpu.memory_space<vmem>>, vector<16x16xf32>
    %162 = arith.subf %161, %4 : vector<16x16xf32>
    %163 = arith.mulf %162, %162 : vector<16x16xf32>
    %cst_41 = arith.constant -5.000000e+01 : f32
    %164 = vector.broadcast %cst_41 : f32 to vector<16x16xf32>
    %165 = arith.mulf %163, %164 : vector<16x16xf32>
    %166 = math.exp %165 : vector<16x16xf32>
    %cst_42 = arith.constant 0.960789442 : f32
    %167 = vector.broadcast %cst_42 : f32 to vector<16x16xf32>
    %168 = arith.mulf %166, %167 : vector<16x16xf32>
    %169 = arith.mulf %168, %161 : vector<16x16xf32>
    %170 = arith.addf %157, %169 : vector<16x16xf32>
    %171 = arith.addf %158, %168 : vector<16x16xf32>
    %c1_i32_43 = arith.constant 1 : i32
    %172 = arith.addi %1, %c1_i32_43 : i32
    %173 = arith.index_cast %172 : i32 to index
    %c6_44 = arith.constant 6 : index
    %174 = vector.load %arg1[%173, %c6_44] : memref<22x22xf32, #tpu.memory_space<vmem>>, vector<16x16xf32>
    %175 = arith.subf %174, %4 : vector<16x16xf32>
    %176 = arith.mulf %175, %175 : vector<16x16xf32>
    %cst_45 = arith.constant -5.000000e+01 : f32
    %177 = vector.broadcast %cst_45 : f32 to vector<16x16xf32>
    %178 = arith.mulf %176, %177 : vector<16x16xf32>
    %179 = math.exp %178 : vector<16x16xf32>
    %cst_46 = arith.constant 0.937067449 : f32
    %180 = vector.broadcast %cst_46 : f32 to vector<16x16xf32>
    %181 = arith.mulf %179, %180 : vector<16x16xf32>
    %182 = arith.mulf %181, %174 : vector<16x16xf32>
    %183 = arith.addf %170, %182 : vector<16x16xf32>
    %184 = arith.addf %171, %181 : vector<16x16xf32>
    %c2_i32 = arith.constant 2 : i32
    %185 = arith.addi %1, %c2_i32 : i32
    %186 = arith.index_cast %185 : i32 to index
    %c0_47 = arith.constant 0 : index
    %187 = vector.load %arg1[%186, %c0_47] : memref<22x22xf32, #tpu.memory_space<vmem>>, vector<16x16xf32>
    %188 = arith.subf %187, %4 : vector<16x16xf32>
    %189 = arith.mulf %188, %188 : vector<16x16xf32>
    %cst_48 = arith.constant -5.000000e+01 : f32
    %190 = vector.broadcast %cst_48 : f32 to vector<16x16xf32>
    %191 = arith.mulf %189, %190 : vector<16x16xf32>
    %192 = math.exp %191 : vector<16x16xf32>
    %cst_49 = arith.constant 0.951229453 : f32
    %193 = vector.broadcast %cst_49 : f32 to vector<16x16xf32>
    %194 = arith.mulf %192, %193 : vector<16x16xf32>
    %195 = arith.mulf %194, %187 : vector<16x16xf32>
    %196 = arith.addf %183, %195 : vector<16x16xf32>
    %197 = arith.addf %184, %194 : vector<16x16xf32>
    %c2_i32_50 = arith.constant 2 : i32
    %198 = arith.addi %1, %c2_i32_50 : i32
    %199 = arith.index_cast %198 : i32 to index
    %c1_51 = arith.constant 1 : index
    %200 = vector.load %arg1[%199, %c1_51] : memref<22x22xf32, #tpu.memory_space<vmem>>, vector<16x16xf32>
    %201 = arith.subf %200, %4 : vector<16x16xf32>
    %202 = arith.mulf %201, %201 : vector<16x16xf32>
    %cst_52 = arith.constant -5.000000e+01 : f32
    %203 = vector.broadcast %cst_52 : f32 to vector<16x16xf32>
    %204 = arith.mulf %202, %203 : vector<16x16xf32>
    %205 = math.exp %204 : vector<16x16xf32>
    %cst_53 = arith.constant 0.975309908 : f32
    %206 = vector.broadcast %cst_53 : f32 to vector<16x16xf32>
    %207 = arith.mulf %205, %206 : vector<16x16xf32>
    %208 = arith.mulf %207, %200 : vector<16x16xf32>
    %209 = arith.addf %196, %208 : vector<16x16xf32>
    %210 = arith.addf %197, %207 : vector<16x16xf32>
    %c2_i32_54 = arith.constant 2 : i32
    %211 = arith.addi %1, %c2_i32_54 : i32
    %212 = arith.index_cast %211 : i32 to index
    %c2_55 = arith.constant 2 : index
    %213 = vector.load %arg1[%212, %c2_55] : memref<22x22xf32, #tpu.memory_space<vmem>>, vector<16x16xf32>
    %214 = arith.subf %213, %4 : vector<16x16xf32>
    %215 = arith.mulf %214, %214 : vector<16x16xf32>
    %cst_56 = arith.constant -5.000000e+01 : f32
    %216 = vector.broadcast %cst_56 : f32 to vector<16x16xf32>
    %217 = arith.mulf %215, %216 : vector<16x16xf32>
    %218 = math.exp %217 : vector<16x16xf32>
    %cst_57 = arith.constant 0.990049839 : f32
    %219 = vector.broadcast %cst_57 : f32 to vector<16x16xf32>
    %220 = arith.mulf %218, %219 : vector<16x16xf32>
    %221 = arith.mulf %220, %213 : vector<16x16xf32>
    %222 = arith.addf %209, %221 : vector<16x16xf32>
    %223 = arith.addf %210, %220 : vector<16x16xf32>
    %c2_i32_58 = arith.constant 2 : i32
    %224 = arith.addi %1, %c2_i32_58 : i32
    %225 = arith.index_cast %224 : i32 to index
    %c3_59 = arith.constant 3 : index
    %226 = vector.load %arg1[%225, %c3_59] : memref<22x22xf32, #tpu.memory_space<vmem>>, vector<16x16xf32>
    %227 = arith.subf %226, %4 : vector<16x16xf32>
    %228 = arith.mulf %227, %227 : vector<16x16xf32>
    %cst_60 = arith.constant -5.000000e+01 : f32
    %229 = vector.broadcast %cst_60 : f32 to vector<16x16xf32>
    %230 = arith.mulf %228, %229 : vector<16x16xf32>
    %231 = math.exp %230 : vector<16x16xf32>
    %cst_61 = arith.constant 0.995012462 : f32
    %232 = vector.broadcast %cst_61 : f32 to vector<16x16xf32>
    %233 = arith.mulf %231, %232 : vector<16x16xf32>
    %234 = arith.mulf %233, %226 : vector<16x16xf32>
    %235 = arith.addf %222, %234 : vector<16x16xf32>
    %236 = arith.addf %223, %233 : vector<16x16xf32>
    %c2_i32_62 = arith.constant 2 : i32
    %237 = arith.addi %1, %c2_i32_62 : i32
    %238 = arith.index_cast %237 : i32 to index
    %c4_63 = arith.constant 4 : index
    %239 = vector.load %arg1[%238, %c4_63] : memref<22x22xf32, #tpu.memory_space<vmem>>, vector<16x16xf32>
    %240 = arith.subf %239, %4 : vector<16x16xf32>
    %241 = arith.mulf %240, %240 : vector<16x16xf32>
    %cst_64 = arith.constant -5.000000e+01 : f32
    %242 = vector.broadcast %cst_64 : f32 to vector<16x16xf32>
    %243 = arith.mulf %241, %242 : vector<16x16xf32>
    %244 = math.exp %243 : vector<16x16xf32>
    %cst_65 = arith.constant 0.990049839 : f32
    %245 = vector.broadcast %cst_65 : f32 to vector<16x16xf32>
    %246 = arith.mulf %244, %245 : vector<16x16xf32>
    %247 = arith.mulf %246, %239 : vector<16x16xf32>
    %248 = arith.addf %235, %247 : vector<16x16xf32>
    %249 = arith.addf %236, %246 : vector<16x16xf32>
    %c2_i32_66 = arith.constant 2 : i32
    %250 = arith.addi %1, %c2_i32_66 : i32
    %251 = arith.index_cast %250 : i32 to index
    %c5_67 = arith.constant 5 : index
    %252 = vector.load %arg1[%251, %c5_67] : memref<22x22xf32, #tpu.memory_space<vmem>>, vector<16x16xf32>
    %253 = arith.subf %252, %4 : vector<16x16xf32>
    %254 = arith.mulf %253, %253 : vector<16x16xf32>
    %cst_68 = arith.constant -5.000000e+01 : f32
    %255 = vector.broadcast %cst_68 : f32 to vector<16x16xf32>
    %256 = arith.mulf %254, %255 : vector<16x16xf32>
    %257 = math.exp %256 : vector<16x16xf32>
    %cst_69 = arith.constant 0.975309908 : f32
    %258 = vector.broadcast %cst_69 : f32 to vector<16x16xf32>
    %259 = arith.mulf %257, %258 : vector<16x16xf32>
    %260 = arith.mulf %259, %252 : vector<16x16xf32>
    %261 = arith.addf %248, %260 : vector<16x16xf32>
    %262 = arith.addf %249, %259 : vector<16x16xf32>
    %c2_i32_70 = arith.constant 2 : i32
    %263 = arith.addi %1, %c2_i32_70 : i32
    %264 = arith.index_cast %263 : i32 to index
    %c6_71 = arith.constant 6 : index
    %265 = vector.load %arg1[%264, %c6_71] : memref<22x22xf32, #tpu.memory_space<vmem>>, vector<16x16xf32>
    %266 = arith.subf %265, %4 : vector<16x16xf32>
    %267 = arith.mulf %266, %266 : vector<16x16xf32>
    %cst_72 = arith.constant -5.000000e+01 : f32
    %268 = vector.broadcast %cst_72 : f32 to vector<16x16xf32>
    %269 = arith.mulf %267, %268 : vector<16x16xf32>
    %270 = math.exp %269 : vector<16x16xf32>
    %cst_73 = arith.constant 0.951229453 : f32
    %271 = vector.broadcast %cst_73 : f32 to vector<16x16xf32>
    %272 = arith.mulf %270, %271 : vector<16x16xf32>
    %273 = arith.mulf %272, %265 : vector<16x16xf32>
    %274 = arith.addf %261, %273 : vector<16x16xf32>
    %275 = arith.addf %262, %272 : vector<16x16xf32>
    %c3_i32_74 = arith.constant 3 : i32
    %276 = arith.addi %1, %c3_i32_74 : i32
    %277 = arith.index_cast %276 : i32 to index
    %c0_75 = arith.constant 0 : index
    %278 = vector.load %arg1[%277, %c0_75] : memref<22x22xf32, #tpu.memory_space<vmem>>, vector<16x16xf32>
    %279 = arith.subf %278, %4 : vector<16x16xf32>
    %280 = arith.mulf %279, %279 : vector<16x16xf32>
    %cst_76 = arith.constant -5.000000e+01 : f32
    %281 = vector.broadcast %cst_76 : f32 to vector<16x16xf32>
    %282 = arith.mulf %280, %281 : vector<16x16xf32>
    %283 = math.exp %282 : vector<16x16xf32>
    %cst_77 = arith.constant 0.955997467 : f32
    %284 = vector.broadcast %cst_77 : f32 to vector<16x16xf32>
    %285 = arith.mulf %283, %284 : vector<16x16xf32>
    %286 = arith.mulf %285, %278 : vector<16x16xf32>
    %287 = arith.addf %274, %286 : vector<16x16xf32>
    %288 = arith.addf %275, %285 : vector<16x16xf32>
    %c3_i32_78 = arith.constant 3 : i32
    %289 = arith.addi %1, %c3_i32_78 : i32
    %290 = arith.index_cast %289 : i32 to index
    %c1_79 = arith.constant 1 : index
    %291 = vector.load %arg1[%290, %c1_79] : memref<22x22xf32, #tpu.memory_space<vmem>>, vector<16x16xf32>
    %292 = arith.subf %291, %4 : vector<16x16xf32>
    %293 = arith.mulf %292, %292 : vector<16x16xf32>
    %cst_80 = arith.constant -5.000000e+01 : f32
    %294 = vector.broadcast %cst_80 : f32 to vector<16x16xf32>
    %295 = arith.mulf %293, %294 : vector<16x16xf32>
    %296 = math.exp %295 : vector<16x16xf32>
    %cst_81 = arith.constant 0.980198681 : f32
    %297 = vector.broadcast %cst_81 : f32 to vector<16x16xf32>
    %298 = arith.mulf %296, %297 : vector<16x16xf32>
    %299 = arith.mulf %298, %291 : vector<16x16xf32>
    %300 = arith.addf %287, %299 : vector<16x16xf32>
    %301 = arith.addf %288, %298 : vector<16x16xf32>
    %c3_i32_82 = arith.constant 3 : i32
    %302 = arith.addi %1, %c3_i32_82 : i32
    %303 = arith.index_cast %302 : i32 to index
    %c2_83 = arith.constant 2 : index
    %304 = vector.load %arg1[%303, %c2_83] : memref<22x22xf32, #tpu.memory_space<vmem>>, vector<16x16xf32>
    %305 = arith.subf %304, %4 : vector<16x16xf32>
    %306 = arith.mulf %305, %305 : vector<16x16xf32>
    %cst_84 = arith.constant -5.000000e+01 : f32
    %307 = vector.broadcast %cst_84 : f32 to vector<16x16xf32>
    %308 = arith.mulf %306, %307 : vector<16x16xf32>
    %309 = math.exp %308 : vector<16x16xf32>
    %cst_85 = arith.constant 0.995012462 : f32
    %310 = vector.broadcast %cst_85 : f32 to vector<16x16xf32>
    %311 = arith.mulf %309, %310 : vector<16x16xf32>
    %312 = arith.mulf %311, %304 : vector<16x16xf32>
    %313 = arith.addf %300, %312 : vector<16x16xf32>
    %314 = arith.addf %301, %311 : vector<16x16xf32>
    %c3_i32_86 = arith.constant 3 : i32
    %315 = arith.addi %1, %c3_i32_86 : i32
    %316 = arith.index_cast %315 : i32 to index
    %c3_87 = arith.constant 3 : index
    %317 = vector.load %arg1[%316, %c3_87] : memref<22x22xf32, #tpu.memory_space<vmem>>, vector<16x16xf32>
    %318 = arith.subf %317, %4 : vector<16x16xf32>
    %319 = arith.mulf %318, %318 : vector<16x16xf32>
    %cst_88 = arith.constant -5.000000e+01 : f32
    %320 = vector.broadcast %cst_88 : f32 to vector<16x16xf32>
    %321 = arith.mulf %319, %320 : vector<16x16xf32>
    %322 = math.exp %321 : vector<16x16xf32>
    %cst_89 = arith.constant 1.000000e+00 : f32
    %323 = vector.broadcast %cst_89 : f32 to vector<16x16xf32>
    %324 = arith.mulf %322, %323 : vector<16x16xf32>
    %325 = arith.mulf %324, %317 : vector<16x16xf32>
    %326 = arith.addf %313, %325 : vector<16x16xf32>
    %327 = arith.addf %314, %324 : vector<16x16xf32>
    %c3_i32_90 = arith.constant 3 : i32
    %328 = arith.addi %1, %c3_i32_90 : i32
    %329 = arith.index_cast %328 : i32 to index
    %c4_91 = arith.constant 4 : index
    %330 = vector.load %arg1[%329, %c4_91] : memref<22x22xf32, #tpu.memory_space<vmem>>, vector<16x16xf32>
    %331 = arith.subf %330, %4 : vector<16x16xf32>
    %332 = arith.mulf %331, %331 : vector<16x16xf32>
    %cst_92 = arith.constant -5.000000e+01 : f32
    %333 = vector.broadcast %cst_92 : f32 to vector<16x16xf32>
    %334 = arith.mulf %332, %333 : vector<16x16xf32>
    %335 = math.exp %334 : vector<16x16xf32>
    %cst_93 = arith.constant 0.995012462 : f32
    %336 = vector.broadcast %cst_93 : f32 to vector<16x16xf32>
    %337 = arith.mulf %335, %336 : vector<16x16xf32>
    %338 = arith.mulf %337, %330 : vector<16x16xf32>
    %339 = arith.addf %326, %338 : vector<16x16xf32>
    %340 = arith.addf %327, %337 : vector<16x16xf32>
    %c3_i32_94 = arith.constant 3 : i32
    %341 = arith.addi %1, %c3_i32_94 : i32
    %342 = arith.index_cast %341 : i32 to index
    %c5_95 = arith.constant 5 : index
    %343 = vector.load %arg1[%342, %c5_95] : memref<22x22xf32, #tpu.memory_space<vmem>>, vector<16x16xf32>
    %344 = arith.subf %343, %4 : vector<16x16xf32>
    %345 = arith.mulf %344, %344 : vector<16x16xf32>
    %cst_96 = arith.constant -5.000000e+01 : f32
    %346 = vector.broadcast %cst_96 : f32 to vector<16x16xf32>
    %347 = arith.mulf %345, %346 : vector<16x16xf32>
    %348 = math.exp %347 : vector<16x16xf32>
    %cst_97 = arith.constant 0.980198681 : f32
    %349 = vector.broadcast %cst_97 : f32 to vector<16x16xf32>
    %350 = arith.mulf %348, %349 : vector<16x16xf32>
    %351 = arith.mulf %350, %343 : vector<16x16xf32>
    %352 = arith.addf %339, %351 : vector<16x16xf32>
    %353 = arith.addf %340, %350 : vector<16x16xf32>
    %c3_i32_98 = arith.constant 3 : i32
    %354 = arith.addi %1, %c3_i32_98 : i32
    %355 = arith.index_cast %354 : i32 to index
    %c6_99 = arith.constant 6 : index
    %356 = vector.load %arg1[%355, %c6_99] : memref<22x22xf32, #tpu.memory_space<vmem>>, vector<16x16xf32>
    %357 = arith.subf %356, %4 : vector<16x16xf32>
    %358 = arith.mulf %357, %357 : vector<16x16xf32>
    %cst_100 = arith.constant -5.000000e+01 : f32
    %359 = vector.broadcast %cst_100 : f32 to vector<16x16xf32>
    %360 = arith.mulf %358, %359 : vector<16x16xf32>
    %361 = math.exp %360 : vector<16x16xf32>
    %cst_101 = arith.constant 0.955997467 : f32
    %362 = vector.broadcast %cst_101 : f32 to vector<16x16xf32>
    %363 = arith.mulf %361, %362 : vector<16x16xf32>
    %364 = arith.mulf %363, %356 : vector<16x16xf32>
    %365 = arith.addf %352, %364 : vector<16x16xf32>
    %366 = arith.addf %353, %363 : vector<16x16xf32>
    %c4_i32 = arith.constant 4 : i32
    %367 = arith.addi %1, %c4_i32 : i32
    %368 = arith.index_cast %367 : i32 to index
    %c0_102 = arith.constant 0 : index
    %369 = vector.load %arg1[%368, %c0_102] : memref<22x22xf32, #tpu.memory_space<vmem>>, vector<16x16xf32>
    %370 = arith.subf %369, %4 : vector<16x16xf32>
    %371 = arith.mulf %370, %370 : vector<16x16xf32>
    %cst_103 = arith.constant -5.000000e+01 : f32
    %372 = vector.broadcast %cst_103 : f32 to vector<16x16xf32>
    %373 = arith.mulf %371, %372 : vector<16x16xf32>
    %374 = math.exp %373 : vector<16x16xf32>
    %cst_104 = arith.constant 0.951229453 : f32
    %375 = vector.broadcast %cst_104 : f32 to vector<16x16xf32>
    %376 = arith.mulf %374, %375 : vector<16x16xf32>
    %377 = arith.mulf %376, %369 : vector<16x16xf32>
    %378 = arith.addf %365, %377 : vector<16x16xf32>
    %379 = arith.addf %366, %376 : vector<16x16xf32>
    %c4_i32_105 = arith.constant 4 : i32
    %380 = arith.addi %1, %c4_i32_105 : i32
    %381 = arith.index_cast %380 : i32 to index
    %c1_106 = arith.constant 1 : index
    %382 = vector.load %arg1[%381, %c1_106] : memref<22x22xf32, #tpu.memory_space<vmem>>, vector<16x16xf32>
    %383 = arith.subf %382, %4 : vector<16x16xf32>
    %384 = arith.mulf %383, %383 : vector<16x16xf32>
    %cst_107 = arith.constant -5.000000e+01 : f32
    %385 = vector.broadcast %cst_107 : f32 to vector<16x16xf32>
    %386 = arith.mulf %384, %385 : vector<16x16xf32>
    %387 = math.exp %386 : vector<16x16xf32>
    %cst_108 = arith.constant 0.975309908 : f32
    %388 = vector.broadcast %cst_108 : f32 to vector<16x16xf32>
    %389 = arith.mulf %387, %388 : vector<16x16xf32>
    %390 = arith.mulf %389, %382 : vector<16x16xf32>
    %391 = arith.addf %378, %390 : vector<16x16xf32>
    %392 = arith.addf %379, %389 : vector<16x16xf32>
    %c4_i32_109 = arith.constant 4 : i32
    %393 = arith.addi %1, %c4_i32_109 : i32
    %394 = arith.index_cast %393 : i32 to index
    %c2_110 = arith.constant 2 : index
    %395 = vector.load %arg1[%394, %c2_110] : memref<22x22xf32, #tpu.memory_space<vmem>>, vector<16x16xf32>
    %396 = arith.subf %395, %4 : vector<16x16xf32>
    %397 = arith.mulf %396, %396 : vector<16x16xf32>
    %cst_111 = arith.constant -5.000000e+01 : f32
    %398 = vector.broadcast %cst_111 : f32 to vector<16x16xf32>
    %399 = arith.mulf %397, %398 : vector<16x16xf32>
    %400 = math.exp %399 : vector<16x16xf32>
    %cst_112 = arith.constant 0.990049839 : f32
    %401 = vector.broadcast %cst_112 : f32 to vector<16x16xf32>
    %402 = arith.mulf %400, %401 : vector<16x16xf32>
    %403 = arith.mulf %402, %395 : vector<16x16xf32>
    %404 = arith.addf %391, %403 : vector<16x16xf32>
    %405 = arith.addf %392, %402 : vector<16x16xf32>
    %c4_i32_113 = arith.constant 4 : i32
    %406 = arith.addi %1, %c4_i32_113 : i32
    %407 = arith.index_cast %406 : i32 to index
    %c3_114 = arith.constant 3 : index
    %408 = vector.load %arg1[%407, %c3_114] : memref<22x22xf32, #tpu.memory_space<vmem>>, vector<16x16xf32>
    %409 = arith.subf %408, %4 : vector<16x16xf32>
    %410 = arith.mulf %409, %409 : vector<16x16xf32>
    %cst_115 = arith.constant -5.000000e+01 : f32
    %411 = vector.broadcast %cst_115 : f32 to vector<16x16xf32>
    %412 = arith.mulf %410, %411 : vector<16x16xf32>
    %413 = math.exp %412 : vector<16x16xf32>
    %cst_116 = arith.constant 0.995012462 : f32
    %414 = vector.broadcast %cst_116 : f32 to vector<16x16xf32>
    %415 = arith.mulf %413, %414 : vector<16x16xf32>
    %416 = arith.mulf %415, %408 : vector<16x16xf32>
    %417 = arith.addf %404, %416 : vector<16x16xf32>
    %418 = arith.addf %405, %415 : vector<16x16xf32>
    %c4_i32_117 = arith.constant 4 : i32
    %419 = arith.addi %1, %c4_i32_117 : i32
    %420 = arith.index_cast %419 : i32 to index
    %c4_118 = arith.constant 4 : index
    %421 = vector.load %arg1[%420, %c4_118] : memref<22x22xf32, #tpu.memory_space<vmem>>, vector<16x16xf32>
    %422 = arith.subf %421, %4 : vector<16x16xf32>
    %423 = arith.mulf %422, %422 : vector<16x16xf32>
    %cst_119 = arith.constant -5.000000e+01 : f32
    %424 = vector.broadcast %cst_119 : f32 to vector<16x16xf32>
    %425 = arith.mulf %423, %424 : vector<16x16xf32>
    %426 = math.exp %425 : vector<16x16xf32>
    %cst_120 = arith.constant 0.990049839 : f32
    %427 = vector.broadcast %cst_120 : f32 to vector<16x16xf32>
    %428 = arith.mulf %426, %427 : vector<16x16xf32>
    %429 = arith.mulf %428, %421 : vector<16x16xf32>
    %430 = arith.addf %417, %429 : vector<16x16xf32>
    %431 = arith.addf %418, %428 : vector<16x16xf32>
    %c4_i32_121 = arith.constant 4 : i32
    %432 = arith.addi %1, %c4_i32_121 : i32
    %433 = arith.index_cast %432 : i32 to index
    %c5_122 = arith.constant 5 : index
    %434 = vector.load %arg1[%433, %c5_122] : memref<22x22xf32, #tpu.memory_space<vmem>>, vector<16x16xf32>
    %435 = arith.subf %434, %4 : vector<16x16xf32>
    %436 = arith.mulf %435, %435 : vector<16x16xf32>
    %cst_123 = arith.constant -5.000000e+01 : f32
    %437 = vector.broadcast %cst_123 : f32 to vector<16x16xf32>
    %438 = arith.mulf %436, %437 : vector<16x16xf32>
    %439 = math.exp %438 : vector<16x16xf32>
    %cst_124 = arith.constant 0.975309908 : f32
    %440 = vector.broadcast %cst_124 : f32 to vector<16x16xf32>
    %441 = arith.mulf %439, %440 : vector<16x16xf32>
    %442 = arith.mulf %441, %434 : vector<16x16xf32>
    %443 = arith.addf %430, %442 : vector<16x16xf32>
    %444 = arith.addf %431, %441 : vector<16x16xf32>
    %c4_i32_125 = arith.constant 4 : i32
    %445 = arith.addi %1, %c4_i32_125 : i32
    %446 = arith.index_cast %445 : i32 to index
    %c6_126 = arith.constant 6 : index
    %447 = vector.load %arg1[%446, %c6_126] : memref<22x22xf32, #tpu.memory_space<vmem>>, vector<16x16xf32>
    %448 = arith.subf %447, %4 : vector<16x16xf32>
    %449 = arith.mulf %448, %448 : vector<16x16xf32>
    %cst_127 = arith.constant -5.000000e+01 : f32
    %450 = vector.broadcast %cst_127 : f32 to vector<16x16xf32>
    %451 = arith.mulf %449, %450 : vector<16x16xf32>
    %452 = math.exp %451 : vector<16x16xf32>
    %cst_128 = arith.constant 0.951229453 : f32
    %453 = vector.broadcast %cst_128 : f32 to vector<16x16xf32>
    %454 = arith.mulf %452, %453 : vector<16x16xf32>
    %455 = arith.mulf %454, %447 : vector<16x16xf32>
    %456 = arith.addf %443, %455 : vector<16x16xf32>
    %457 = arith.addf %444, %454 : vector<16x16xf32>
    %c5_i32 = arith.constant 5 : i32
    %458 = arith.addi %1, %c5_i32 : i32
    %459 = arith.index_cast %458 : i32 to index
    %c0_129 = arith.constant 0 : index
    %460 = vector.load %arg1[%459, %c0_129] : memref<22x22xf32, #tpu.memory_space<vmem>>, vector<16x16xf32>
    %461 = arith.subf %460, %4 : vector<16x16xf32>
    %462 = arith.mulf %461, %461 : vector<16x16xf32>
    %cst_130 = arith.constant -5.000000e+01 : f32
    %463 = vector.broadcast %cst_130 : f32 to vector<16x16xf32>
    %464 = arith.mulf %462, %463 : vector<16x16xf32>
    %465 = math.exp %464 : vector<16x16xf32>
    %cst_131 = arith.constant 0.937067449 : f32
    %466 = vector.broadcast %cst_131 : f32 to vector<16x16xf32>
    %467 = arith.mulf %465, %466 : vector<16x16xf32>
    %468 = arith.mulf %467, %460 : vector<16x16xf32>
    %469 = arith.addf %456, %468 : vector<16x16xf32>
    %470 = arith.addf %457, %467 : vector<16x16xf32>
    %c5_i32_132 = arith.constant 5 : i32
    %471 = arith.addi %1, %c5_i32_132 : i32
    %472 = arith.index_cast %471 : i32 to index
    %c1_133 = arith.constant 1 : index
    %473 = vector.load %arg1[%472, %c1_133] : memref<22x22xf32, #tpu.memory_space<vmem>>, vector<16x16xf32>
    %474 = arith.subf %473, %4 : vector<16x16xf32>
    %475 = arith.mulf %474, %474 : vector<16x16xf32>
    %cst_134 = arith.constant -5.000000e+01 : f32
    %476 = vector.broadcast %cst_134 : f32 to vector<16x16xf32>
    %477 = arith.mulf %475, %476 : vector<16x16xf32>
    %478 = math.exp %477 : vector<16x16xf32>
    %cst_135 = arith.constant 0.960789442 : f32
    %479 = vector.broadcast %cst_135 : f32 to vector<16x16xf32>
    %480 = arith.mulf %478, %479 : vector<16x16xf32>
    %481 = arith.mulf %480, %473 : vector<16x16xf32>
    %482 = arith.addf %469, %481 : vector<16x16xf32>
    %483 = arith.addf %470, %480 : vector<16x16xf32>
    %c5_i32_136 = arith.constant 5 : i32
    %484 = arith.addi %1, %c5_i32_136 : i32
    %485 = arith.index_cast %484 : i32 to index
    %c2_137 = arith.constant 2 : index
    %486 = vector.load %arg1[%485, %c2_137] : memref<22x22xf32, #tpu.memory_space<vmem>>, vector<16x16xf32>
    %487 = arith.subf %486, %4 : vector<16x16xf32>
    %488 = arith.mulf %487, %487 : vector<16x16xf32>
    %cst_138 = arith.constant -5.000000e+01 : f32
    %489 = vector.broadcast %cst_138 : f32 to vector<16x16xf32>
    %490 = arith.mulf %488, %489 : vector<16x16xf32>
    %491 = math.exp %490 : vector<16x16xf32>
    %cst_139 = arith.constant 0.975309908 : f32
    %492 = vector.broadcast %cst_139 : f32 to vector<16x16xf32>
    %493 = arith.mulf %491, %492 : vector<16x16xf32>
    %494 = arith.mulf %493, %486 : vector<16x16xf32>
    %495 = arith.addf %482, %494 : vector<16x16xf32>
    %496 = arith.addf %483, %493 : vector<16x16xf32>
    %c5_i32_140 = arith.constant 5 : i32
    %497 = arith.addi %1, %c5_i32_140 : i32
    %498 = arith.index_cast %497 : i32 to index
    %c3_141 = arith.constant 3 : index
    %499 = vector.load %arg1[%498, %c3_141] : memref<22x22xf32, #tpu.memory_space<vmem>>, vector<16x16xf32>
    %500 = arith.subf %499, %4 : vector<16x16xf32>
    %501 = arith.mulf %500, %500 : vector<16x16xf32>
    %cst_142 = arith.constant -5.000000e+01 : f32
    %502 = vector.broadcast %cst_142 : f32 to vector<16x16xf32>
    %503 = arith.mulf %501, %502 : vector<16x16xf32>
    %504 = math.exp %503 : vector<16x16xf32>
    %cst_143 = arith.constant 0.980198681 : f32
    %505 = vector.broadcast %cst_143 : f32 to vector<16x16xf32>
    %506 = arith.mulf %504, %505 : vector<16x16xf32>
    %507 = arith.mulf %506, %499 : vector<16x16xf32>
    %508 = arith.addf %495, %507 : vector<16x16xf32>
    %509 = arith.addf %496, %506 : vector<16x16xf32>
    %c5_i32_144 = arith.constant 5 : i32
    %510 = arith.addi %1, %c5_i32_144 : i32
    %511 = arith.index_cast %510 : i32 to index
    %c4_145 = arith.constant 4 : index
    %512 = vector.load %arg1[%511, %c4_145] : memref<22x22xf32, #tpu.memory_space<vmem>>, vector<16x16xf32>
    %513 = arith.subf %512, %4 : vector<16x16xf32>
    %514 = arith.mulf %513, %513 : vector<16x16xf32>
    %cst_146 = arith.constant -5.000000e+01 : f32
    %515 = vector.broadcast %cst_146 : f32 to vector<16x16xf32>
    %516 = arith.mulf %514, %515 : vector<16x16xf32>
    %517 = math.exp %516 : vector<16x16xf32>
    %cst_147 = arith.constant 0.975309908 : f32
    %518 = vector.broadcast %cst_147 : f32 to vector<16x16xf32>
    %519 = arith.mulf %517, %518 : vector<16x16xf32>
    %520 = arith.mulf %519, %512 : vector<16x16xf32>
    %521 = arith.addf %508, %520 : vector<16x16xf32>
    %522 = arith.addf %509, %519 : vector<16x16xf32>
    %c5_i32_148 = arith.constant 5 : i32
    %523 = arith.addi %1, %c5_i32_148 : i32
    %524 = arith.index_cast %523 : i32 to index
    %c5_149 = arith.constant 5 : index
    %525 = vector.load %arg1[%524, %c5_149] : memref<22x22xf32, #tpu.memory_space<vmem>>, vector<16x16xf32>
    %526 = arith.subf %525, %4 : vector<16x16xf32>
    %527 = arith.mulf %526, %526 : vector<16x16xf32>
    %cst_150 = arith.constant -5.000000e+01 : f32
    %528 = vector.broadcast %cst_150 : f32 to vector<16x16xf32>
    %529 = arith.mulf %527, %528 : vector<16x16xf32>
    %530 = math.exp %529 : vector<16x16xf32>
    %cst_151 = arith.constant 0.960789442 : f32
    %531 = vector.broadcast %cst_151 : f32 to vector<16x16xf32>
    %532 = arith.mulf %530, %531 : vector<16x16xf32>
    %533 = arith.mulf %532, %525 : vector<16x16xf32>
    %534 = arith.addf %521, %533 : vector<16x16xf32>
    %535 = arith.addf %522, %532 : vector<16x16xf32>
    %c5_i32_152 = arith.constant 5 : i32
    %536 = arith.addi %1, %c5_i32_152 : i32
    %537 = arith.index_cast %536 : i32 to index
    %c6_153 = arith.constant 6 : index
    %538 = vector.load %arg1[%537, %c6_153] : memref<22x22xf32, #tpu.memory_space<vmem>>, vector<16x16xf32>
    %539 = arith.subf %538, %4 : vector<16x16xf32>
    %540 = arith.mulf %539, %539 : vector<16x16xf32>
    %cst_154 = arith.constant -5.000000e+01 : f32
    %541 = vector.broadcast %cst_154 : f32 to vector<16x16xf32>
    %542 = arith.mulf %540, %541 : vector<16x16xf32>
    %543 = math.exp %542 : vector<16x16xf32>
    %cst_155 = arith.constant 0.937067449 : f32
    %544 = vector.broadcast %cst_155 : f32 to vector<16x16xf32>
    %545 = arith.mulf %543, %544 : vector<16x16xf32>
    %546 = arith.mulf %545, %538 : vector<16x16xf32>
    %547 = arith.addf %534, %546 : vector<16x16xf32>
    %548 = arith.addf %535, %545 : vector<16x16xf32>
    %c6_i32 = arith.constant 6 : i32
    %549 = arith.addi %1, %c6_i32 : i32
    %550 = arith.index_cast %549 : i32 to index
    %c0_156 = arith.constant 0 : index
    %551 = vector.load %arg1[%550, %c0_156] : memref<22x22xf32, #tpu.memory_space<vmem>>, vector<16x16xf32>
    %552 = arith.subf %551, %4 : vector<16x16xf32>
    %553 = arith.mulf %552, %552 : vector<16x16xf32>
    %cst_157 = arith.constant -5.000000e+01 : f32
    %554 = vector.broadcast %cst_157 : f32 to vector<16x16xf32>
    %555 = arith.mulf %553, %554 : vector<16x16xf32>
    %556 = math.exp %555 : vector<16x16xf32>
    %cst_158 = arith.constant 0.91393119 : f32
    %557 = vector.broadcast %cst_158 : f32 to vector<16x16xf32>
    %558 = arith.mulf %556, %557 : vector<16x16xf32>
    %559 = arith.mulf %558, %551 : vector<16x16xf32>
    %560 = arith.addf %547, %559 : vector<16x16xf32>
    %561 = arith.addf %548, %558 : vector<16x16xf32>
    %c6_i32_159 = arith.constant 6 : i32
    %562 = arith.addi %1, %c6_i32_159 : i32
    %563 = arith.index_cast %562 : i32 to index
    %c1_160 = arith.constant 1 : index
    %564 = vector.load %arg1[%563, %c1_160] : memref<22x22xf32, #tpu.memory_space<vmem>>, vector<16x16xf32>
    %565 = arith.subf %564, %4 : vector<16x16xf32>
    %566 = arith.mulf %565, %565 : vector<16x16xf32>
    %cst_161 = arith.constant -5.000000e+01 : f32
    %567 = vector.broadcast %cst_161 : f32 to vector<16x16xf32>
    %568 = arith.mulf %566, %567 : vector<16x16xf32>
    %569 = math.exp %568 : vector<16x16xf32>
    %cst_162 = arith.constant 0.937067449 : f32
    %570 = vector.broadcast %cst_162 : f32 to vector<16x16xf32>
    %571 = arith.mulf %569, %570 : vector<16x16xf32>
    %572 = arith.mulf %571, %564 : vector<16x16xf32>
    %573 = arith.addf %560, %572 : vector<16x16xf32>
    %574 = arith.addf %561, %571 : vector<16x16xf32>
    %c6_i32_163 = arith.constant 6 : i32
    %575 = arith.addi %1, %c6_i32_163 : i32
    %576 = arith.index_cast %575 : i32 to index
    %c2_164 = arith.constant 2 : index
    %577 = vector.load %arg1[%576, %c2_164] : memref<22x22xf32, #tpu.memory_space<vmem>>, vector<16x16xf32>
    %578 = arith.subf %577, %4 : vector<16x16xf32>
    %579 = arith.mulf %578, %578 : vector<16x16xf32>
    %cst_165 = arith.constant -5.000000e+01 : f32
    %580 = vector.broadcast %cst_165 : f32 to vector<16x16xf32>
    %581 = arith.mulf %579, %580 : vector<16x16xf32>
    %582 = math.exp %581 : vector<16x16xf32>
    %cst_166 = arith.constant 0.951229453 : f32
    %583 = vector.broadcast %cst_166 : f32 to vector<16x16xf32>
    %584 = arith.mulf %582, %583 : vector<16x16xf32>
    %585 = arith.mulf %584, %577 : vector<16x16xf32>
    %586 = arith.addf %573, %585 : vector<16x16xf32>
    %587 = arith.addf %574, %584 : vector<16x16xf32>
    %c6_i32_167 = arith.constant 6 : i32
    %588 = arith.addi %1, %c6_i32_167 : i32
    %589 = arith.index_cast %588 : i32 to index
    %c3_168 = arith.constant 3 : index
    %590 = vector.load %arg1[%589, %c3_168] : memref<22x22xf32, #tpu.memory_space<vmem>>, vector<16x16xf32>
    %591 = arith.subf %590, %4 : vector<16x16xf32>
    %592 = arith.mulf %591, %591 : vector<16x16xf32>
    %cst_169 = arith.constant -5.000000e+01 : f32
    %593 = vector.broadcast %cst_169 : f32 to vector<16x16xf32>
    %594 = arith.mulf %592, %593 : vector<16x16xf32>
    %595 = math.exp %594 : vector<16x16xf32>
    %cst_170 = arith.constant 0.955997467 : f32
    %596 = vector.broadcast %cst_170 : f32 to vector<16x16xf32>
    %597 = arith.mulf %595, %596 : vector<16x16xf32>
    %598 = arith.mulf %597, %590 : vector<16x16xf32>
    %599 = arith.addf %586, %598 : vector<16x16xf32>
    %600 = arith.addf %587, %597 : vector<16x16xf32>
    %c6_i32_171 = arith.constant 6 : i32
    %601 = arith.addi %1, %c6_i32_171 : i32
    %602 = arith.index_cast %601 : i32 to index
    %c4_172 = arith.constant 4 : index
    %603 = vector.load %arg1[%602, %c4_172] : memref<22x22xf32, #tpu.memory_space<vmem>>, vector<16x16xf32>
    %604 = arith.subf %603, %4 : vector<16x16xf32>
    %605 = arith.mulf %604, %604 : vector<16x16xf32>
    %cst_173 = arith.constant -5.000000e+01 : f32
    %606 = vector.broadcast %cst_173 : f32 to vector<16x16xf32>
    %607 = arith.mulf %605, %606 : vector<16x16xf32>
    %608 = math.exp %607 : vector<16x16xf32>
    %cst_174 = arith.constant 0.951229453 : f32
    %609 = vector.broadcast %cst_174 : f32 to vector<16x16xf32>
    %610 = arith.mulf %608, %609 : vector<16x16xf32>
    %611 = arith.mulf %610, %603 : vector<16x16xf32>
    %612 = arith.addf %599, %611 : vector<16x16xf32>
    %613 = arith.addf %600, %610 : vector<16x16xf32>
    %c6_i32_175 = arith.constant 6 : i32
    %614 = arith.addi %1, %c6_i32_175 : i32
    %615 = arith.index_cast %614 : i32 to index
    %c5_176 = arith.constant 5 : index
    %616 = vector.load %arg1[%615, %c5_176] : memref<22x22xf32, #tpu.memory_space<vmem>>, vector<16x16xf32>
    %617 = arith.subf %616, %4 : vector<16x16xf32>
    %618 = arith.mulf %617, %617 : vector<16x16xf32>
    %cst_177 = arith.constant -5.000000e+01 : f32
    %619 = vector.broadcast %cst_177 : f32 to vector<16x16xf32>
    %620 = arith.mulf %618, %619 : vector<16x16xf32>
    %621 = math.exp %620 : vector<16x16xf32>
    %cst_178 = arith.constant 0.937067449 : f32
    %622 = vector.broadcast %cst_178 : f32 to vector<16x16xf32>
    %623 = arith.mulf %621, %622 : vector<16x16xf32>
    %624 = arith.mulf %623, %616 : vector<16x16xf32>
    %625 = arith.addf %612, %624 : vector<16x16xf32>
    %626 = arith.addf %613, %623 : vector<16x16xf32>
    %c6_i32_179 = arith.constant 6 : i32
    %627 = arith.addi %1, %c6_i32_179 : i32
    %628 = arith.index_cast %627 : i32 to index
    %c6_180 = arith.constant 6 : index
    %629 = vector.load %arg1[%628, %c6_180] : memref<22x22xf32, #tpu.memory_space<vmem>>, vector<16x16xf32>
    %630 = arith.subf %629, %4 : vector<16x16xf32>
    %631 = arith.mulf %630, %630 : vector<16x16xf32>
    %cst_181 = arith.constant -5.000000e+01 : f32
    %632 = vector.broadcast %cst_181 : f32 to vector<16x16xf32>
    %633 = arith.mulf %631, %632 : vector<16x16xf32>
    %634 = math.exp %633 : vector<16x16xf32>
    %cst_182 = arith.constant 0.91393119 : f32
    %635 = vector.broadcast %cst_182 : f32 to vector<16x16xf32>
    %636 = arith.mulf %634, %635 : vector<16x16xf32>
    %637 = arith.mulf %636, %629 : vector<16x16xf32>
    %638 = arith.addf %625, %637 : vector<16x16xf32>
    %639 = arith.addf %626, %636 : vector<16x16xf32>
    %640 = arith.divf %638, %639 : vector<16x16xf32>
    %c0_183 = arith.constant 0 : index
    %c0_184 = arith.constant 0 : index
    %641 = vector.load %arg2[%c0_183, %c0_184] : memref<16x16xf32, #tpu.memory_space<vmem>>, vector<16x16xf32>
    tpu.vector_store %arg2[%c0_183, %c0_184], %640 {strides = array<i32>} : memref<16x16xf32, #tpu.memory_space<vmem>>, vector<16x16xf32>,
    return
  }
  func.func @transform_0(%arg0: i32) -> (i32, i32) {
    %c0_i32 = arith.constant 0 : i32
    %c0_i32_0 = arith.constant 0 : i32
    %c0_i32_1 = arith.constant 0 : i32
    return %c0_i32, %c0_i32_0 : i32, i32
  }
  func.func @transform_1(%arg0: i32) -> (i32, i32) {
    %c0_i32 = arith.constant 0 : i32
    %c0_i32_0 = arith.constant 0 : i32
    return %arg0, %c0_i32 : i32, i32
  }
}

</mosaic_0001>

<bundles_post_ra>
// kernel: tpu_custom_call.1
= control target key start
LH: loop header
LB: loop body
LE: loop exit
PB: predicated region body
PF: predicated region fallthrough
CT: control target
= control target key end

     0   :  { %6 = vsyncpa [#allocation3], 0  ;;  %s2780_s0 = inlined_call_operand.hbm [shape: f32[22,22], index: 0, kind: input, shape index: {}]   ;;  %s2781_s1 = inlined_call_operand.hbm [shape: f32[16,16], index: 1, kind: output, shape index: {}]  }
   0x1   :  { %7 = vsyncpa [#allocation4], 0  ;;  %s12_s8 = sshll.u32 %s2780_s0, 4  ;;  %s1966_s9 = smov [#allocation2]   ;;  %s13_s8 = int_to_ptr.hbm [resolvable:$true] %s12_s8 }
   0x2   :  { %s14_s10 = sshll.u32 %s1966_s9, 4  ;;  %s1967_s11 = smov 128   ;;  %s15_s10 = int_to_ptr.vmem [resolvable:$true] %s14_s10 }
   0x3   :  { %s1968_s12 = smov 8  }
   0x4   :  { %20 = dma.hbm_to_vmem [thread:$0]  %s13_s8, 384, %s15_s10, [#allocation3], %s1967_s11, %s1967_s11, %s1968_s12  }
   0x5   :  { %1962 = dma.done.wait [#allocation3], 384  }
   0x6   :  { %1963 = vsyncadd [#allocation3], 4294966912  ;;  %v1995_v0 = vld [vmem:[#allocation2 + $0x3] sm:$0xff]  ;;  %v1997_v1 = vld [vmem:[#allocation2 + $0xb] sm:$0xff]  ;;  %s1969_s13 = smov 126   ;;  %s1970_s0 = smov 125  }
   0x7   :  { %v1999_v2 = vld [vmem:[#allocation2] sm:$0xff]  ;;  %55 = vrot.lane.b32.xlu1 %v1995_v0, %s1969_s13  ;;  %35 = vrot.lane.b32.xlu0 %v1995_v0, %s1970_s0  ;;  %v2007_v4 = vld [vmem:[#allocation2 + $0x8] sm:$0xff]  ;;  %s1971_s14 = smov 127   ;;  %s1972_s15 = smov 1   ;;  %vm1669_vm8 = vcmask 130048  }
   0x8   :  { %v135_v3 = vsub.f32 %v1999_v2, %v1995_v0  ;;  %v136_v5 = vsub.f32 %v2007_v4, %v1997_v1  ;;  %95 = vrot.lane.b32.xlu2 %v1995_v0, %s1971_s14  ;;  %s1973_s16 = smov 2   ;;  %s1974_s17 = smov 3   ;;  %v2029_v17 = vld [vmem:[#allocation2 + $0x9] sm:$0xff]  ;;  %v2033_v22 = vld [vmem:[#allocation2 + $0x1] sm:$0xff] }
   0x9   :  { %v380_v18 = vsub.f32 %v2029_v17, %v1997_v1  ;;  %v379_v23 = vsub.f32 %v2033_v22, %v1995_v0  ;;  %s1975_s18 = smov 124   ;;  %s1976_s19 = smov 123  }
   0xa   :  { %v137_v6 = vmul.f32 %v135_v3, %v135_v3  ;;  %v138_v7 = vmul.f32 %v136_v5, %v136_v5  ;;  %s1977_s20 = smov 122   ;;  %s1978_s21 = smov [#allocation5]  }
   0xb   :  { %v382_v19 = vmul.f32 %v380_v18, %v380_v18  ;;  %v381_v25 = vmul.f32 %v379_v23, %v379_v23  ;;  %s1676_s22 = sshll.u32 %s1978_s21, 4  ;;  %s1678_s25 = sshll.u32 %s2781_s1, 4  ;;  %s1677_s22 = int_to_ptr.vmem [resolvable:$true] %s1676_s22  ;;  %s1679_s25 = int_to_ptr.hbm [resolvable:$true] %s1678_s25 }
   0xc   :  { %v139_v8 = vmul.f32 -50.0, %v137_v6  ;;  %v140_v9 = vmul.f32 -50.0, %v138_v7 }
   0xd   :  { %v384_v20 = vmul.f32 -50.0, %v382_v19  ;;  %v383_v27 = vmul.f32 -50.0, %v381_v25 }
   0xe   :  { %v141_v10 = vmul.f32 1.442695, %v139_v8  ;;  %v143_v11 = vmul.f32 1.442695, %v140_v9 }
   0xf   :  { %57 = vrot.lane.b32.xlu1 %v1997_v1, %s1969_s13  ;;  %37 = vrot.lane.b32.xlu0 %v1997_v1, %s1970_s0  ;;  %v387_v21 = vmul.f32 1.442695, %v384_v20  ;;  %v385_v29 = vmul.f32 1.442695, %v383_v27 }
  0x10   :  { %1710 = vpow2.f32 %v141_v10 }
  0x11   :  { %1712 = vpow2.f32 %v143_v11 }
  0x12   :  { %1714 = vpow2.f32 %v387_v21 }
  0x13   :  { %1716 = vpow2.f32 %v385_v29 }
  0x16   :  { %v1711_v12 = vpop.eup %1710 }
  0x17   :  { %v1713_v13 = vpop.eup %1712  ;;  %v145_v14 = vmul.f32 0.95599747, %v1711_v12  ;;  %97 = vrot.lane.b32.xlu0 %v1997_v1, %s1971_s14 }
  0x18   :  { %v146_v15 = vmul.f32 0.95599747, %v1713_v13  ;;  %v1715_v24 = vpop.eup %1714 }
  0x19   :  { %161 = vrot.lane.b32.xlu1 %v145_v14, %s1970_s0  ;;  %v390_v26 = vmul.f32 0.9801987, %v1715_v24  ;;  %v1717_v30 = vpop.eup %1716  ;;  %v147_v32 = vmul.f32 %v145_v14, %v1999_v2 }
  0x1a   :  { %163 = vrot.lane.b32.xlu2 %v146_v15, %s1970_s0  ;;  %v148_v16 = vmul.f32 %v146_v15, %v2007_v4  ;;  %v389_v31 = vmul.f32 0.9801987, %v1717_v30 }
  0x1b   :  { %v392_v28 = vmul.f32 %v390_v26, %v2029_v17 }
  0x1c   :  { %v391_v33 = vmul.f32 %v389_v31, %v2033_v22 }
  0x1f   :  { %153 = vrot.lane.b32.xlu0 %v148_v16, %s1970_s0 }
  0x21   :  { %171 = vrot.lane.b32.xlu1 %v1997_v1, %s1972_s15 }
  0x22   :  { %151 = vrot.lane.b32.xlu2 %v147_v32, %s1970_s0 }
  0x27   :  { %169 = vrot.lane.b32.xlu0 %v1995_v0, %s1972_s15 }
  0x29   :  { %211 = vrot.lane.b32.xlu1 %v1997_v1, %s1973_s16 }
  0x2a   :  { %395 = vrot.lane.b32.xlu2 %v391_v33, %s1970_s0 }
  0x2f   :  { %209 = vrot.lane.b32.xlu0 %v1995_v0, %s1973_s16 }
  0x31   :  { %251 = vrot.lane.b32.xlu1 %v1997_v1, %s1974_s17 }
  0x32   :  { %407 = vrot.lane.b32.xlu2 %v390_v26, %s1970_s0 }
  0x37   :  { %249 = vrot.lane.b32.xlu0 %v1995_v0, %s1974_s17 }
  0x39   :  { %405 = vrot.lane.b32.xlu1 %v389_v31, %s1970_s0 }
  0x3f   :  { %397 = vrot.lane.b32.xlu0 %v392_v28, %s1970_s0 }
  0x62   :  { %v2043_v34 = vpop.permute.xlu2 %95 }
  0x63   :  { %2788 = vst [vmem:[#allocation8_spill] sm:$0xff] %v2043_v34  ;;  %v101_v37 = vsub.f32 %v1999_v2, %v2043_v34  ;;  %v345_v54 = vsub.f32 %v2033_v22, %v2043_v34 }
  0x65   :  { %v103_v40 = vmul.f32 %v101_v37, %v101_v37  ;;  %v347_v61 = vmul.f32 %v345_v54, %v345_v54 }
  0x67   :  { %v105_v45 = vmul.f32 -50.0, %v103_v40  ;;  %v349_v7 = vmul.f32 -50.0, %v347_v61 }
  0x69   :  { %v107_v48 = vmul.f32 1.442695, %v105_v45  ;;  %v351_v14 = vmul.f32 1.442695, %v349_v7 }
  0x79   :  { %v2046_v35 = vpop.permute.xlu1 %55  ;;  %v2048_v36 = vpop.permute.xlu0 %35 }
  0x7a   :  { %v61_v38 = vsub.f32 %v1999_v2, %v2046_v35  ;;  %v311_v45 = vsub.f32 %v2033_v22, %v2046_v35 }
  0x7c   :  { %v63_v39 = vmul.f32 %v61_v38, %v61_v38  ;;  %v313_v54 = vmul.f32 %v311_v45, %v311_v45 }
  0x7e   :  { %v65_v41 = vmul.f32 -50.0, %v63_v39 }
  0x80   :  { %v67_v44 = vmul.f32 1.442695, %v65_v41 }
  0x81   :  { %v2055_v42 = vpop.permute.xlu1 %57  ;;  %v2057_v43 = vpop.permute.xlu0 %37 }
  0x82   :  { %2789 = vst [vmem:[#allocation9_spill] sm:$0xff] %v2055_v42  ;;  %v62_v46 = vsub.f32 %v2007_v4, %v2055_v42  ;;  %v312_v47 = vsub.f32 %v2029_v17, %v2055_v42  ;;  %1718 = vpow2.f32 %v67_v44 }
  0x83   :  { %1720 = vpow2.f32 %v107_v48 }
  0x84   :  { %v64_v49 = vmul.f32 %v62_v46, %v62_v46  ;;  %v314_v51 = vmul.f32 %v312_v47, %v312_v47 }
  0x86   :  { %v66_v50 = vmul.f32 -50.0, %v64_v49  ;;  %v316_v58 = vmul.f32 -50.0, %v314_v51 }
  0x88   :  { %v69_v53 = vmul.f32 1.442695, %v66_v50  ;;  %v1719_v57 = vpop.eup %1718  ;;  %v319_v3 = vmul.f32 1.442695, %v316_v58 }
  0x89   :  { %v2063_v52 = vpop.permute.xlu0 %97  ;;  %v2071_v59 = vmul.f32 0.93706745, %v1719_v57  ;;  %v1721_v63 = vpop.eup %1720 }
  0x8a   :  { %v102_v56 = vsub.f32 %v2007_v4, %v2063_v52  ;;  %1722 = vpow2.f32 %v69_v53  ;;  %v2079_v9 = vmul.f32 0.95122945, %v1721_v63 }
  0x8b   :  { %v2067_v55 = vpop.permute.xlu1 %161  ;;  %87 = vrot.lane.b32.xlu0 %v2071_v59, %s1971_s14 }
  0x8c   :  { %v104_v60 = vmul.f32 %v102_v56, %v102_v56 }
  0x8e   :  { %v106_v62 = vmul.f32 -50.0, %v104_v60 }
  0x90   :  { %v109_v5 = vmul.f32 1.442695, %v106_v62  ;;  %v1723_v10 = vpop.eup %1722  ;;  %v346_v62 = vsub.f32 %v2029_v17, %v2063_v52 }
  0x91   :  { %v2075_v6 = vpop.permute.xlu0 %153  ;;  %v2085_v13 = vmul.f32 0.93706745, %v1723_v10  ;;  %v315_v10 = vmul.f32 -50.0, %v313_v54 }
  0x92   :  { %1724 = vpow2.f32 %v109_v5 }
  0x93   :  { %v2077_v8 = vpop.permute.xlu1 %171  ;;  %1726 = vpow2.f32 %v319_v3  ;;  %127 = vrot.lane.b32.xlu0 %v2079_v9, %s1969_s13  ;;  %89 = vrot.lane.b32.xlu1 %v2085_v13, %s1971_s14 }
  0x94   :  { %v176_v11 = vsub.f32 %v2007_v4, %v2077_v8  ;;  %v414_v12 = vsub.f32 %v2029_v17, %v2077_v8  ;;  %1728 = vpow2.f32 %v351_v14 }
  0x96   :  { %v178_v15 = vmul.f32 %v176_v11, %v176_v11  ;;  %v416_v16 = vmul.f32 %v414_v12, %v414_v12 }
  0x98   :  { %v180_v18 = vmul.f32 -50.0, %v178_v15  ;;  %v1725_v19 = vpop.eup %1724  ;;  %v418_v24 = vmul.f32 -50.0, %v416_v16 }
  0x99   :  { %v1727_v20 = vpop.eup %1726  ;;  %v2091_v21 = vpop.permute.xlu0 %169  ;;  %v2095_v26 = vmul.f32 0.95122945, %v1725_v19  ;;  %v317_v19 = vmul.f32 1.442695, %v315_v10  ;;  %v2169_v10 = vld [vmem:[#allocation2 + $0x2] sm:$0xff] }
  0x9a   :  { %v183_v23 = vmul.f32 1.442695, %v180_v18  ;;  %v175_v27 = vsub.f32 %v1999_v2, %v2091_v21  ;;  %v2101_v29 = vmul.f32 0.96078944, %v1727_v20  ;;  %v421_v31 = vmul.f32 1.442695, %v418_v24  ;;  %v1729_v37 = vpop.eup %1728 }
  0x9b   :  { %v2093_v25 = vpop.permute.xlu1 %211  ;;  %129 = vrot.lane.b32.xlu1 %v2095_v26, %s1969_s13  ;;  %v2113_v47 = vmul.f32 0.9753099, %v1729_v37  ;;  %v413_v11 = vsub.f32 %v2033_v22, %v2091_v21  ;;  %v348_v18 = vmul.f32 %v346_v62, %v346_v62  ;;  %v73_v62 = vmul.f32 %v2071_v59, %v1999_v2 }
  0x9c   :  { %1730 = vpow2.f32 %v183_v23  ;;  %v216_v28 = vsub.f32 %v2007_v4, %v2093_v25  ;;  %v177_v30 = vmul.f32 %v175_v27, %v175_v27  ;;  %339 = vrot.lane.b32.xlu0 %v2101_v29, %s1971_s14  ;;  %v324_v59 = vmul.f32 %v2101_v29, %v2029_v17 }
  0x9d   :  { %1732 = vpow2.f32 %v421_v31  ;;  %v415_v20 = vmul.f32 %v413_v11, %v413_v11 }
  0x9e   :  { %v218_v32 = vmul.f32 %v216_v28, %v216_v28  ;;  %v179_v33 = vmul.f32 -50.0, %v177_v30  ;;  %v350_v28 = vmul.f32 -50.0, %v348_v18 }
  0xa0   :  { %v220_v38 = vmul.f32 -50.0, %v218_v32  ;;  %v181_v39 = vmul.f32 1.442695, %v179_v33  ;;  %v417_v32 = vmul.f32 -50.0, %v415_v20 }
  0xa1   :  { %v2107_v41 = vpop.permute.xlu0 %209 }
  0xa2   :  { %v1731_v40 = vpop.eup %1730  ;;  %v223_v44 = vmul.f32 1.442695, %v220_v38  ;;  %1734 = vpow2.f32 %v181_v39  ;;  %v215_v49 = vsub.f32 %v1999_v2, %v2107_v41  ;;  %v353_v38 = vmul.f32 1.442695, %v350_v28 }
  0xa3   :  { %v2111_v46 = vpop.permute.xlu1 %251  ;;  %v186_v48 = vmul.f32 0.95122945, %v1731_v40  ;;  %v1733_v57 = vpop.eup %1732  ;;  %v419_v39 = vmul.f32 1.442695, %v417_v32  ;;  %v357_v28 = vmul.f32 %v2113_v47, %v2033_v22 }
  0xa4   :  { %1736 = vpow2.f32 %v223_v44  ;;  %v256_v50 = vsub.f32 %v2007_v4, %v2111_v46  ;;  %v217_v51 = vmul.f32 %v215_v49, %v215_v49  ;;  %371 = vrot.lane.b32.xlu0 %v2113_v47, %s1969_s13  ;;  %v2134_v15 = vmul.f32 0.9753099, %v1733_v57 }
  0xa5   :  { %203 = vrot.lane.b32.xlu2 %v186_v48, %s1975_s18  ;;  %v188_v37 = vmul.f32 %v186_v48, %v2007_v4 }
  0xa6   :  { %v258_v53 = vmul.f32 %v256_v50, %v256_v50  ;;  %v219_v56 = vmul.f32 -50.0, %v217_v51 }
  0xa8   :  { %v260_v58 = vmul.f32 -50.0, %v258_v53  ;;  %v1735_v60 = vpop.eup %1734  ;;  %v221_v61 = vmul.f32 1.442695, %v219_v56  ;;  %v447_v56 = vsub.f32 %v2033_v22, %v2107_v41 }
  0xa9   :  { %v2124_v3 = vpop.permute.xlu0 %249  ;;  %v2126_v5 = vmul.f32 0.95122945, %v1735_v60  ;;  %v482_v60 = vsub.f32 %v2029_v17, %v2111_v46 }
  0xaa   :  { %v1737_v63 = vpop.eup %1736  ;;  %2790 = vst [vmem:[#allocation10_spill] sm:$0xff] %v2124_v3  ;;  %v263_v7 = vmul.f32 1.442695, %v260_v58  ;;  %1738 = vpow2.f32 %v221_v61  ;;  %v255_v14 = vsub.f32 %v1999_v2, %v2124_v3  ;;  %v449_v58 = vmul.f32 %v447_v56, %v447_v56 }
  0xab   :  { %v226_v12 = vmul.f32 0.93706745, %v1737_v63  ;;  %201 = vrot.lane.b32.xlu1 %v2126_v5, %s1975_s18  ;;  %v113_v61 = vmul.f32 %v2079_v9, %v1999_v2  ;;  %v537_v9 = vsub.f32 %v2169_v10, %v2046_v35 }
  0xac   :  { %1740 = vpow2.f32 %v263_v7  ;;  %v257_v16 = vmul.f32 %v255_v14, %v255_v14  ;;  %441 = vrot.lane.b32.xlu0 %v2134_v15, %s1975_s18  ;;  %v451_v63 = vmul.f32 -50.0, %v449_v58  ;;  %v484_v7 = vmul.f32 %v482_v60, %v482_v60 }
  0xad   :  { %243 = vrot.lane.b32.xlu2 %v226_v12, %s1976_s19  ;;  %1742 = vpow2.f32 %v317_v19  ;;  %v228_v50 = vmul.f32 %v226_v12, %v2007_v4  ;;  %v539_v19 = vmul.f32 %v537_v9, %v537_v9 }
  0xae   :  { %v259_v23 = vmul.f32 -50.0, %v257_v16  ;;  %v453_v12 = vmul.f32 1.442695, %v451_v63  ;;  %v486_v14 = vmul.f32 -50.0, %v484_v7  ;;  %v74_v16 = vmul.f32 %v2085_v13, %v2007_v4 }
  0xaf   :  { %v448_v13 = vsub.f32 %v2029_v17, %v2093_v25 }
  0xb0   :  { %v1739_v24 = vpop.eup %1738  ;;  %v261_v27 = vmul.f32 1.442695, %v259_v23  ;;  %v489_v18 = vmul.f32 1.442695, %v486_v14  ;;  %v2184_v23 = vpop.permute.xlu2 %163 }
  0xb1   :  { %v2139_v31 = vmul.f32 0.93706745, %v1739_v24  ;;  %v541_v24 = vmul.f32 -50.0, %v539_v19 }
  0xb2   :  { %v1741_v30 = vpop.eup %1740  ;;  %1744 = vpow2.f32 %v261_v27  ;;  %v2186_v27 = vld [vmem:[#allocation2 + $0xa] sm:$0xff] }
  0xb3   :  { %v266_v33 = vmul.f32 0.9139312, %v1741_v30  ;;  %241 = vrot.lane.b32.xlu1 %v2139_v31, %s1976_s19  ;;  %v1743_v40 = vpop.eup %1742  ;;  %1746 = vpow2.f32 %v353_v38  ;;  %v114_v30 = vmul.f32 %v2095_v26, %v2007_v4  ;;  %v543_v32 = vmul.f32 1.442695, %v541_v24 }
  0xb4   :  { %193 = vrot.lane.b32.xlu0 %v188_v37, %s1975_s18  ;;  %1748 = vpow2.f32 %v419_v39  ;;  %v321_v49 = vmul.f32 0.96078944, %v1743_v40  ;;  %v450_v38 = vmul.f32 %v448_v13, %v448_v13 }
  0xb5   :  { %283 = vrot.lane.b32.xlu2 %v266_v33, %s1977_s20  ;;  %v268_v57 = vmul.f32 %v266_v33, %v2007_v4  ;;  %1750 = vpow2.f32 %v453_v12  ;;  %v538_v33 = vsub.f32 %v2186_v27, %v2055_v42  ;;  %v227_v12 = vmul.f32 %v2139_v31, %v1999_v2 }
  0xb6   :  { %v323_v11 = vmul.f32 %v321_v49, %v2033_v22  ;;  %1752 = vpow2.f32 %v489_v18  ;;  %v452_v26 = vmul.f32 -50.0, %v450_v38  ;;  %v639_v31 = vsub.f32 %v2169_v10, %v2091_v21  ;;  %v2239_v38 = vpop.permute.xlu0 %397 }
  0xb7   :  { %1754 = vpow2.f32 %v543_v32  ;;  %v540_v40 = vmul.f32 %v538_v33, %v538_v33 }
  0xb8   :  { %v1745_v44 = vpop.eup %1744  ;;  %v2201_v47 = vpop.permute.xlu2 %151 }
  0xb9   :  { %v2146_v45 = vmul.f32 0.9139312, %v1745_v44  ;;  %v1747_v48 = vpop.eup %1746 }
  0xba   :  { %v1749_v51 = vpop.eup %1748  ;;  %v2153_v53 = vmul.f32 0.9753099, %v1747_v48  ;;  %v187_v48 = vmul.f32 %v2126_v5, %v1999_v2 }
  0xbb   :  { %281 = vrot.lane.b32.xlu1 %v2146_v45, %s1977_s20  ;;  %v423_v54 = vmul.f32 0.9753099, %v1749_v51  ;;  %v1751_v29 = vpop.eup %1750  ;;  %v542_v51 = vmul.f32 -50.0, %v540_v40  ;;  %v572_v40 = vsub.f32 %v2186_v27, %v2063_v52 }
  0xbc   :  { %233 = vrot.lane.b32.xlu0 %v228_v50, %s1976_s19  ;;  %v457_v37 = vmul.f32 0.96078944, %v1751_v29  ;;  %v1753_v39 = vpop.eup %1752  ;;  %v426_v50 = vmul.f32 %v2134_v15, %v2029_v17  ;;  %v606_v15 = vsub.f32 %v2186_v27, %v1997_v1 }
  0xbd   :  { %337 = vrot.lane.b32.xlu2 %v321_v49, %s1971_s14  ;;  %v425_v20 = vmul.f32 %v423_v54, %v2033_v22  ;;  %v2199_v44 = vmul.f32 0.93706745, %v1753_v39  ;;  %v481_v49 = vsub.f32 %v2033_v22, %v2124_v3  ;;  %v1755_v60 = vpop.eup %1754  ;;  %v545_v5 = vmul.f32 1.442695, %v542_v51 }
  0xbe   :  { %v459_v7 = vmul.f32 %v457_v37, %v2033_v22  ;;  %v640_v51 = vsub.f32 %v2186_v27, %v2077_v8 }
  0xbf   :  { %v494_v56 = vmul.f32 %v2199_v44, %v2029_v17  ;;  %v483_v58 = vmul.f32 %v481_v49, %v481_v49  ;;  %v358_v49 = vmul.f32 %v2153_v53, %v2029_v17 }
  0xc0   :  { %v2223_v14 = vpop.permute.xlu2 %395 }
  0xc1   :  { %v485_v63 = vmul.f32 -50.0, %v483_v58 }
  0xc3   :  { %373 = vrot.lane.b32.xlu1 %v2153_v53, %s1969_s13  ;;  %v605_v53 = vsub.f32 %v2169_v10, %v1995_v0 }
  0xc4   :  { %273 = vrot.lane.b32.xlu0 %v268_v57, %s1977_s20  ;;  %v455_v57 = vmul.f32 1.442695, %v452_v26 }
  0xc5   :  { %439 = vrot.lane.b32.xlu2 %v423_v54, %s1975_s18  ;;  %v571_v54 = vsub.f32 %v2169_v10, %v2043_v34 }
  0xc6   :  { %1756 = vpow2.f32 %v455_v57 }
  0xc7   :  { %1758 = vpow2.f32 %v545_v5 }
  0xc8   :  { %v2236_v33 = vpop.permute.xlu2 %407 }
  0xcb   :  { %117 = vrot.lane.b32.xlu1 %v113_v61, %s1969_s13  ;;  %v573_v61 = vmul.f32 %v571_v54, %v571_v54 }
  0xcc   :  { %327 = vrot.lane.b32.xlu0 %v323_v11, %s1971_s14  ;;  %v608_v11 = vmul.f32 %v606_v15, %v606_v15  ;;  %v1757_v19 = vpop.eup %1756 }
  0xcd   :  { %77 = vrot.lane.b32.xlu2 %v73_v62, %s1971_s14  ;;  %v2218_v62 = vmul.f32 0.9753099, %v1755_v60  ;;  %v575_v9 = vmul.f32 -50.0, %v573_v61  ;;  %v1759_v24 = vpop.eup %1758  ;;  %v458_v13 = vmul.f32 0.96078944, %v1757_v19  ;;  %v642_v60 = vmul.f32 %v640_v51, %v640_v51  ;;  %v2258_v61 = vpop.permute.xlu1 %405 }
  0xce   :  { %v610_v18 = vmul.f32 -50.0, %v608_v11  ;;  %v548_v32 = vmul.f32 0.9753099, %v1759_v24  ;;  %v41_v19 = vsub.f32 %v1999_v2, %v2048_v36 }
  0xcf   :  { %v460_v11 = vmul.f32 %v458_v13, %v2029_v17 }
  0xd0   :  { %v613_v29 = vmul.f32 1.442695, %v610_v18 }
  0xd3   :  { %329 = vrot.lane.b32.xlu1 %v324_v59, %s1971_s14  ;;  %v549_v59 = vmul.f32 %v2218_v62, %v2169_v10 }
  0xd4   :  { %429 = vrot.lane.b32.xlu0 %v425_v20, %s1975_s18  ;;  %v577_v20 = vmul.f32 1.442695, %v575_v9  ;;  %v644_v9 = vmul.f32 -50.0, %v642_v60 }
  0xd5   :  { %79 = vrot.lane.b32.xlu2 %v74_v16, %s1971_s14  ;;  %v487_v16 = vmul.f32 1.442695, %v485_v63  ;;  %v550_v63 = vmul.f32 %v548_v32, %v2186_v27 }
  0xd6   :  { %v647_v24 = vmul.f32 1.442695, %v644_v9 }
  0xd7   :  { %1760 = vpow2.f32 %v487_v16 }
  0xd8   :  { %1762 = vpow2.f32 %v577_v20 }
  0xd9   :  { %1764 = vpow2.f32 %v613_v29  ;;  %v708_v29 = vsub.f32 %v2186_v27, %v2111_v46 }
  0xdb   :  { %361 = vrot.lane.b32.xlu1 %v357_v28, %s1969_s13  ;;  %v267_v28 = vmul.f32 %v2146_v45, %v1999_v2 }
  0xdc   :  { %473 = vrot.lane.b32.xlu0 %v457_v37, %s1976_s19 }
  0xdd   :  { %119 = vrot.lane.b32.xlu2 %v114_v30, %s1969_s13  ;;  %v641_v30 = vmul.f32 %v639_v31, %v639_v31  ;;  %v1761_v37 = vpop.eup %1760 }
  0xde   :  { %v1763_v45 = vpop.eup %1762  ;;  %v491_v26 = vmul.f32 0.93706745, %v1761_v37 }
  0xdf   :  { %v643_v39 = vmul.f32 -50.0, %v641_v30  ;;  %v581_v54 = vmul.f32 0.99004984, %v1763_v45 }
  0xe1   :  { %v583_v37 = vmul.f32 %v581_v54, %v2169_v10 }
  0xe3   :  { %431 = vrot.lane.b32.xlu1 %v426_v50, %s1975_s18  ;;  %v1765_v50 = vpop.eup %1764 }
  0xe4   :  { %499 = vrot.lane.b32.xlu0 %v494_v56, %s1977_s20  ;;  %v574_v56 = vmul.f32 %v572_v40, %v572_v40  ;;  %v2252_v58 = vmul.f32 0.99501246, %v1765_v50  ;;  %v493_v40 = vmul.f32 %v491_v26, %v2033_v22 }
  0xe5   :  { %191 = vrot.lane.b32.xlu2 %v187_v48, %s1975_s18  ;;  %v645_v48 = vmul.f32 1.442695, %v643_v39  ;;  %v43_v39 = vmul.f32 %v41_v19, %v41_v19 }
  0xe6   :  { %v576_v5 = vmul.f32 -50.0, %v574_v56 }
  0xe7   :  { %1766 = vpow2.f32 %v645_v48  ;;  %v710_v48 = vmul.f32 %v708_v29, %v708_v29  ;;  %v45_v60 = vmul.f32 -50.0, %v43_v39 }
  0xe8   :  { %v579_v16 = vmul.f32 1.442695, %v576_v5 }
  0xea   :  { %1768 = vpow2.f32 %v579_v16 }
  0xeb   :  { %463 = vrot.lane.b32.xlu1 %v459_v7, %s1976_s19  ;;  %v618_v7 = vmul.f32 %v2252_v58, %v2186_v27  ;;  %1770 = vpow2.f32 %v647_v24 }
  0xec   :  { %553 = vrot.lane.b32.xlu0 %v549_v59, %s1971_s14  ;;  %v673_v59 = vsub.f32 %v2169_v10, %v2107_v41 }
  0xed   :  { %231 = vrot.lane.b32.xlu2 %v227_v12, %s1976_s19  ;;  %v607_v12 = vmul.f32 %v605_v53, %v605_v53  ;;  %v1767_v18 = vpop.eup %1766 }
  0xef   :  { %v609_v31 = vmul.f32 -50.0, %v607_v12 }
  0xf0   :  { %v1769_v53 = vpop.eup %1768 }
  0xf1   :  { %v611_v45 = vmul.f32 1.442695, %v609_v31  ;;  %v1771_v12 = vpop.eup %1770  ;;  %v582_v9 = vmul.f32 0.99004984, %v1769_v53 }
  0xf2   :  { %v650_v24 = vmul.f32 0.99004984, %v1771_v12 }
  0xf3   :  { %475 = vrot.lane.b32.xlu1 %v458_v13, %s1976_s19  ;;  %v675_v13 = vmul.f32 %v673_v59, %v673_v59  ;;  %1772 = vpow2.f32 %v611_v45  ;;  %v47_v59 = vmul.f32 1.442695, %v45_v60  ;;  %v674_v45 = vsub.f32 %v2186_v27, %v2093_v25 }
  0xf4   :  { %565 = vrot.lane.b32.xlu0 %v548_v32, %s1971_s14  ;;  %v2279_v32 = vmul.f32 0.99004984, %v1767_v18 }
  0xf5   :  { %271 = vrot.lane.b32.xlu2 %v267_v28, %s1977_s20  ;;  %v42_v28 = vsub.f32 %v2007_v4, %v2057_v43  ;;  %v677_v50 = vmul.f32 -50.0, %v675_v13  ;;  %v293_v13 = vsub.f32 %v2033_v22, %v2048_v36  ;;  %v760_v22 = vsub.f32 %v1997_v1, %v2055_v42 }
  0xf6   :  { %v651_v56 = vmul.f32 %v2279_v32, %v2169_v10  ;;  %v676_v53 = vmul.f32 %v674_v45, %v674_v45  ;;  %v652_v45 = vmul.f32 %v650_v24, %v2186_v27 }
  0xf7   :  { %v44_v51 = vmul.f32 %v42_v28, %v42_v28  ;;  %v679_v5 = vmul.f32 1.442695, %v677_v50 }
  0xf9   :  { %1774 = vpow2.f32 %v679_v5  ;;  %v1773_v19 = vpop.eup %1772 }
  0xfa   :  { %1776 = vpow2.f32 %v47_v59  ;;  %v615_v39 = vmul.f32 0.99501246, %v1773_v19  ;;  %v762_v59 = vmul.f32 %v760_v22, %v760_v22 }
  0xfb   :  { %507 = vrot.lane.b32.xlu1 %v491_v26, %s1977_s20  ;;  %v759_v26 = vsub.f32 %v1995_v0, %v2046_v35 }
  0xfc   :  { %597 = vrot.lane.b32.xlu0 %v581_v54, %s1969_s13  ;;  %v617_v42 = vmul.f32 %v615_v39, %v2169_v10 }
  0xfd   :  { %363 = vrot.lane.b32.xlu2 %v358_v49, %s1969_s13  ;;  %v2256_v15 = vpop.permute.xlu0 %87  ;;  %v761_v16 = vmul.f32 %v759_v26, %v759_v26 }
  0xff   :  { %v2250_v57 = vpop.permute.xlu2 %203  ;;  %v1775_v50 = vpop.eup %1774 }
 0x103   :  { %555 = vrot.lane.b32.xlu1 %v550_v63, %s1971_s14  ;;  %v712_v63 = vmul.f32 -50.0, %v710_v48 }
 0x104   :  { %623 = vrot.lane.b32.xlu0 %v618_v7, %s1970_s0  ;;  %v46_v7 = vmul.f32 -50.0, %v44_v51  ;;  %v1777_v51 = vpop.eup %1776 }
 0x105   :  { %465 = vrot.lane.b32.xlu2 %v460_v11, %s1976_s19  ;;  %v2277_v30 = vpop.permute.xlu0 %127  ;;  %v2283_v49 = vpop.permute.xlu1 %89  ;;  %v715_v18 = vmul.f32 1.442695, %v712_v63 }
 0x106   :  { %v49_v31 = vmul.f32 1.442695, %v46_v7  ;;  %v294_v7 = vsub.f32 %v2029_v17, %v2057_v43 }
 0x107   :  { %v2271_v20 = vpop.permute.xlu2 %243  ;;  %1778 = vpow2.f32 %v715_v18 }
 0x108   :  { %1780 = vpow2.f32 %v49_v31  ;;  %v707_v31 = vsub.f32 %v2169_v10, %v2124_v3 }
 0x10b   :  { %587 = vrot.lane.b32.xlu1 %v583_v37, %s1969_s13  ;;  %v763_v37 = vmul.f32 -50.0, %v761_v16  ;;  %v2318_v16 = vmul.f32 0.9139312, %v1777_v51  ;;  %v764_v51 = vmul.f32 -50.0, %v762_v59 }
 0x10c   :  { %655 = vrot.lane.b32.xlu0 %v651_v56, %s1975_s18  ;;  %v683_v56 = vmul.f32 0.9753099, %v1775_v50  ;;  %v296_v50 = vmul.f32 %v294_v7, %v294_v7 }
 0x10d   :  { %497 = vrot.lane.b32.xlu2 %v493_v40, %s1977_s20  ;;  %v130_v29 = vpop.permute.xlu1 %129  ;;  %v765_v48 = vmul.f32 1.442695, %v763_v37  ;;  %v1779_v60 = vpop.eup %1778 }
 0x10e   :  { %v2294_v11 = vpop.permute.xlu0 %339  ;;  %v1781_v63 = vpop.eup %1780  ;;  %v2322_v19 = vmul.f32 0.95122945, %v1779_v60 }
 0x10f   :  { %v2290_v54 = vpop.permute.xlu2 %283  ;;  %1782 = vpow2.f32 %v765_v48  ;;  %v52_v37 = vmul.f32 0.9139312, %v1781_v63  ;;  %v584_v48 = vmul.f32 %v582_v9, %v2186_v27 }
 0x111   :  { %v94_v22 = vadd.f32 %v2283_v49, %v52_v37  ;;  %v298_v49 = vmul.f32 -50.0, %v296_v50 }
 0x113   :  { %599 = vrot.lane.b32.xlu1 %v582_v9, %s1969_s13  ;;  %v134_v9 = vadd.f32 %v130_v29, %v94_v22  ;;  %v685_v29 = vmul.f32 %v683_v56, %v2169_v10  ;;  %v301_v50 = vmul.f32 1.442695, %v298_v49 }
 0x114   :  { %667 = vrot.lane.b32.xlu0 %v650_v24, %s1975_s18  ;;  %v720_v24 = vmul.f32 %v2322_v19, %v2186_v27 }
 0x115   :  { %509 = vrot.lane.b32.xlu2 %v2199_v44, %s1977_s20  ;;  %v295_v44 = vmul.f32 %v293_v13, %v293_v13  ;;  %v1783_v60 = vpop.eup %1782 }
 0x116   :  { %v2304_v40 = vpop.permute.xlu0 %371 }
 0x117   :  { %v2302_v28 = vpop.permute.xlu2 %337  ;;  %v297_v26 = vmul.f32 -50.0, %v295_v44  ;;  %v93_v44 = vadd.f32 %v2256_v15, %v2318_v16  ;;  %v709_v15 = vmul.f32 %v707_v31, %v707_v31  ;;  %v168_v31 = vadd.f32 %v2184_v23, %v134_v9 }
 0x119   :  { %v299_v13 = vmul.f32 1.442695, %v297_v26  ;;  %v133_v26 = vadd.f32 %v2277_v30, %v93_v44  ;;  %v208_v23 = vadd.f32 %v2250_v57, %v168_v31 }
 0x11b   :  { %631 = vrot.lane.b32.xlu1 %v615_v39, %s1970_s0  ;;  %1784 = vpow2.f32 %v299_v13  ;;  %v167_v30 = vadd.f32 %v2067_v55, %v133_v26  ;;  %v828_v13 = vsub.f32 %v1997_v1, %v1997_v1  ;;  %v248_v57 = vadd.f32 %v2271_v20, %v208_v23 }
 0x11c   :  { %699 = vrot.lane.b32.xlu0 %v683_v56, %s1976_s19 }
 0x11d   :  { %563 = vrot.lane.b32.xlu2 %v2218_v62, %s1971_s14  ;;  %v202_v5 = vpop.permute.xlu1 %201  ;;  %v678_v62 = vmul.f32 -50.0, %v676_v53  ;;  %v793_v53 = vsub.f32 %v1995_v0, %v2043_v34  ;;  %v767_v34 = vmul.f32 1.442695, %v764_v51  ;;  %v288_v20 = vadd.f32 %v2290_v54, %v248_v57 }
 0x11e   :  { %v2320_v18 = vpop.permute.xlu0 %441  ;;  %v53_v54 = vmul.f32 %v2318_v16, %v1999_v2 }
 0x11f   :  { %v2316_v12 = vpop.permute.xlu2 %439  ;;  %v681_v63 = vmul.f32 1.442695, %v678_v62  ;;  %v795_v3 = vmul.f32 %v793_v53, %v793_v53  ;;  %v711_v62 = vmul.f32 -50.0, %v709_v15 }
 0x121   :  { %1786 = vpow2.f32 %v681_v63  ;;  %v1785_v22 = vpop.eup %1784  ;;  %v797_v51 = vmul.f32 -50.0, %v795_v3  ;;  %v713_v53 = vmul.f32 1.442695, %v711_v62  ;;  %v859_v63 = vsub.f32 %v1995_v0, %v2091_v21 }
 0x122   :  { %1788 = vpow2.f32 %v767_v34  ;;  %v54_v62 = vmul.f32 %v52_v37, %v2007_v4 }
 0x123   :  { %657 = vrot.lane.b32.xlu1 %v652_v45, %s1975_s18  ;;  %v2341_v45 = vmul.f32 0.9801987, %v1783_v60  ;;  %v830_v60 = vmul.f32 %v828_v13, %v828_v13  ;;  %1790 = vpow2.f32 %v301_v50  ;;  %v799_v3 = vmul.f32 1.442695, %v797_v51 }
 0x124   :  { %725 = vrot.lane.b32.xlu0 %v720_v24, %s1977_s20  ;;  %1792 = vpow2.f32 %v713_v53  ;;  %v861_v31 = vmul.f32 %v859_v63, %v859_v63  ;;  %v794_v53 = vsub.f32 %v1997_v1, %v2063_v52 }
 0x125   :  { %589 = vrot.lane.b32.xlu2 %v584_v48, %s1969_s13  ;;  %v242_v7 = vpop.permute.xlu1 %241  ;;  %v207_v48 = vadd.f32 %v202_v5, %v167_v30  ;;  %v771_v39 = vmul.f32 %v2341_v45, %v1995_v0  ;;  %v2355_v5 = vmul.f32 0.93706745, %v1785_v22  ;;  %v832_v49 = vmul.f32 -50.0, %v830_v60 }
 0x126   :  { %v194_v44 = vpop.permute.xlu0 %193  ;;  %1794 = vpow2.f32 %v799_v3  ;;  %v796_v63 = vmul.f32 %v794_v53, %v794_v53 }
 0x127   :  { %v2339_v59 = vpop.permute.xlu2 %77  ;;  %v247_v55 = vadd.f32 %v242_v7, %v207_v48  ;;  %v1787_v26 = vpop.eup %1786  ;;  %v835_v22 = vmul.f32 1.442695, %v832_v49 }
 0x128   :  { %v1789_v9 = vpop.eup %1788  ;;  %v684_v7 = vmul.f32 0.9753099, %v1787_v26 }
 0x129   :  { %v770_v13 = vmul.f32 0.9801987, %v1789_v9  ;;  %1796 = vpow2.f32 %v835_v22 }
 0x12b   :  { %689 = vrot.lane.b32.xlu1 %v685_v29, %s1976_s19  ;;  %v1791_v29 = vpop.eup %1790 }
 0x12c   :  { %775 = vrot.lane.b32.xlu0 %v771_v39, %s1971_s14  ;;  %v304_v37 = vmul.f32 0.93706745, %v1791_v29 }
 0x12d   :  { %621 = vrot.lane.b32.xlu2 %v617_v42, %s1970_s0  ;;  %v282_v56 = vpop.permute.xlu1 %281 }
 0x12e   :  { %v287_v24 = vadd.f32 %v282_v56, %v247_v55  ;;  %v234_v15 = vpop.permute.xlu0 %233  ;;  %v863_v55 = vmul.f32 -50.0, %v861_v31  ;;  %v310_v23 = vadd.f32 %v304_v37, %v288_v20  ;;  %v2393_v31 = vld [vmem:[#allocation2 + $0x3] sm:$0xff] }
 0x12f   :  { %v80_v34 = vpop.permute.xlu2 %79  ;;  %v893_v29 = vsub.f32 %v2393_v31, %v2107_v41 }
 0x130   :  { %v309_v42 = vadd.f32 %v2355_v5, %v287_v24  ;;  %v84_v50 = vadd.f32 %v80_v34, %v54_v62  ;;  %v865_v26 = vmul.f32 1.442695, %v863_v55  ;;  %v860_v24 = vsub.f32 %v1997_v1, %v2077_v8  ;;  %v2389_v62 = vld [vmem:[#allocation2 + $0xb] sm:$0xff] }
 0x131   :  { %v83_v34 = vadd.f32 %v2339_v59, %v53_v54 }
 0x132   :  { %v343_v30 = vadd.f32 %v2302_v28, %v309_v42  ;;  %v1793_v28 = vpop.eup %1792  ;;  %1798 = vpow2.f32 %v865_v26  ;;  %v862_v1 = vmul.f32 %v860_v24, %v860_v24  ;;  %v519_v26 = vsub.f32 %v2169_v10, %v2048_v36 }
 0x133   :  { %701 = vrot.lane.b32.xlu1 %v684_v7, %s1976_s19  ;;  %v717_v56 = vmul.f32 0.95122945, %v1793_v28 }
 0x134   :  { %v2367_v0 = vadd.f32 %v2304_v40, %v343_v30  ;;  %787 = vrot.lane.b32.xlu0 %v770_v13, %s1971_s14 }
 0x135   :  { %633 = vrot.lane.b32.xlu2 %v2252_v58, %s1970_s0  ;;  %v374_v48 = vpop.permute.xlu1 %373  ;;  %v1795_v58 = vpop.eup %1794  ;;  %v719_v24 = vmul.f32 %v717_v56, %v2169_v10 }
 0x136   :  { %v274_v39 = vpop.permute.xlu0 %273  ;;  %v803_v3 = vmul.f32 0.99501246, %v1795_v58 }
 0x137   :  { %v120_v4 = vpop.permute.xlu2 %119 }
 0x138   :  { %v124_v51 = vadd.f32 %v120_v4, %v84_v50 }
 0x13a   :  { %v158_v40 = vadd.f32 %v2075_v6, %v124_v51  ;;  %v344_v6 = vadd.f32 %v2294_v11, %v310_v23  ;;  %v772_v11 = vmul.f32 %v2389_v62, %v770_v13  ;;  %v864_v13 = vmul.f32 -50.0, %v862_v1 }
 0x13b   :  { %733 = vrot.lane.b32.xlu1 %v717_v56, %s1977_s20  ;;  %v1912_v56 = vld [vmem:[#allocation2 + $0x1] sm:$0xff] }
 0x13c   :  { %v198_v60 = vadd.f32 %v194_v44, %v158_v40  ;;  %819 = vrot.lane.b32.xlu0 %v803_v3, %s1969_s13  ;;  %v2384_v44 = vpop.eup %1796  ;;  %v378_v57 = vadd.f32 %v374_v48, %v344_v6  ;;  %v686_v48 = vmul.f32 %v684_v7, %v2186_v27  ;;  %v895_v7 = vmul.f32 %v893_v29, %v893_v29 }
 0x13d   :  { %665 = vrot.lane.b32.xlu2 %v2279_v32, %s1975_s18  ;;  %v118_v42 = vpop.permute.xlu1 %117  ;;  %v798_v32 = vmul.f32 -50.0, %v796_v63  ;;  %v838_v50 = vmul.f32 %v2389_v62, %v2384_v44  ;;  %v1799_v4 = vpop.eup %1798  ;;  %v867_v58 = vmul.f32 1.442695, %v864_v13  ;;  %v411_v6 = vadd.f32 %v2258_v61, %v2367_v0 }
 0x13e   :  { %v238_v9 = vadd.f32 %v234_v15, %v198_v60  ;;  %v123_v2 = vadd.f32 %v118_v42, %v83_v34  ;;  %v2386_v59 = vpop.permute.xlu0 %327  ;;  %v306_v15 = vmul.f32 %v304_v37, %v2029_v17  ;;  %v412_v22 = vadd.f32 %v2236_v33, %v378_v57 }
 0x13f   :  { %v192_v16 = vpop.permute.xlu2 %191  ;;  %v801_v28 = vmul.f32 1.442695, %v798_v32  ;;  %v928_v33 = vsub.f32 %v2389_v62, %v2111_v46  ;;  %v2411_v54 = vmul.f32 0.99501246, %v1799_v4  ;;  %v805_v60 = vmul.f32 %v2393_v31, %v803_v3  ;;  %v2423_v3 = vld [vmem:[#allocation2 + $0x4] sm:$0xff] }
 0x140   :  { %v278_v49 = vadd.f32 %v274_v39, %v238_v9  ;;  %v157_v30 = vadd.f32 %v2201_v47, %v123_v2  ;;  %v827_v47 = vsub.f32 %v2393_v31, %v2393_v31  ;;  %v2409_v23 = vadd.f32 %v2320_v18, %v412_v22 }
 0x141   :  { %1800 = vpow2.f32 %v801_v28  ;;  %v897_v63 = vmul.f32 -50.0, %v895_v7  ;;  %v930_v18 = vmul.f32 %v928_v33, %v928_v33  ;;  %v871_v42 = vmul.f32 %v2393_v31, %v2411_v54 }
 0x142   :  { %v197_v20 = vadd.f32 %v192_v16, %v157_v30  ;;  %v308_v17 = vadd.f32 %v306_v15, %v278_v49  ;;  %v829_v39 = vmul.f32 %v827_v47, %v827_v47  ;;  %1802 = vpow2.f32 %v867_v58 }
 0x143   :  { %777 = vrot.lane.b32.xlu1 %v772_v11, %s1971_s14  ;;  %v521_v16 = vmul.f32 %v519_v26, %v519_v26  ;;  %v305_v57 = vmul.f32 %v1912_v56, %v2355_v5  ;;  %v899_v61 = vmul.f32 1.442695, %v897_v63  ;;  %v445_v0 = vadd.f32 %v2316_v12, %v411_v6 }
 0x144   :  { %843 = vrot.lane.b32.xlu0 %v838_v50, %s1970_s0  ;;  %v831_v34 = vmul.f32 -50.0, %v829_v39  ;;  %v932_v32 = vmul.f32 -50.0, %v930_v18  ;;  %v983_v11 = vsub.f32 %v2423_v3, %v2046_v35  ;;  %v894_v33 = vsub.f32 %v2389_v62, %v2093_v25 }
 0x145   :  { %691 = vrot.lane.b32.xlu2 %v686_v48, %s1976_s19  ;;  %v330_v37 = vpop.permute.xlu1 %329  ;;  %v523_v47 = vmul.f32 -50.0, %v521_v16 }
 0x146   :  { %v334_v51 = vadd.f32 %v330_v37, %v308_v17  ;;  %v430_v40 = vpop.permute.xlu0 %429  ;;  %v833_v1 = vmul.f32 1.442695, %v831_v34  ;;  %v935_v22 = vmul.f32 1.442695, %v932_v32  ;;  %v985_v12 = vmul.f32 %v983_v11, %v983_v11 }
 0x147   :  { %v232_v55 = vpop.permute.xlu2 %231  ;;  %v1801_v2 = vpop.eup %1800  ;;  %v520_v17 = vsub.f32 %v2186_v27, %v2057_v43  ;;  %v525_v37 = vmul.f32 1.442695, %v523_v47 }
 0x148   :  { %v237_v53 = vadd.f32 %v232_v55, %v197_v20  ;;  %v1803_v29 = vpop.eup %1802  ;;  %v804_v48 = vmul.f32 0.99501246, %v1801_v2  ;;  %1804 = vpow2.f32 %v833_v1  ;;  %v987_v7 = vmul.f32 -50.0, %v985_v12 }
 0x149   :  { %1806 = vpow2.f32 %v899_v61  ;;  %v870_v13 = vmul.f32 0.99501246, %v1803_v29  ;;  %v522_v26 = vmul.f32 %v520_v17, %v520_v17 }
 0x14a   :  { %1808 = vpow2.f32 %v935_v22  ;;  %v989_v63 = vmul.f32 1.442695, %v987_v7  ;;  %v806_v29 = vmul.f32 %v2389_v62, %v804_v48 }
 0x14b   :  { %809 = vrot.lane.b32.xlu1 %v805_v60, %s1969_s13  ;;  %1810 = vpow2.f32 %v525_v37  ;;  %v524_v2 = vmul.f32 -50.0, %v522_v26 }
 0x14c   :  { %875 = vrot.lane.b32.xlu0 %v871_v42, %s1975_s18  ;;  %v896_v42 = vmul.f32 %v894_v33, %v894_v33  ;;  %1812 = vpow2.f32 %v989_v63 }
 0x14d   :  { %723 = vrot.lane.b32.xlu2 %v719_v24, %s1977_s20  ;;  %v362_v9 = vpop.permute.xlu1 %361 }
 0x14e   :  { %v474_v15 = vpop.permute.xlu0 %473 }
 0x14f   :  { %v272_v49 = vpop.permute.xlu2 %271  ;;  %v2430_v20 = vadd.f32 %v474_v15, %v445_v0  ;;  %v898_v0 = vmul.f32 -50.0, %v896_v42  ;;  %v872_v15 = vmul.f32 %v2389_v62, %v870_v13 }
 0x150   :  { %v277_v30 = vadd.f32 %v272_v49, %v237_v53  ;;  %v1805_v53 = vpop.eup %1804 }
 0x151   :  { %v1807_v60 = vpop.eup %1806  ;;  %v901_v17 = vmul.f32 1.442695, %v898_v0  ;;  %v837_v26 = vmul.f32 %v2393_v31, %v1805_v53 }
 0x152   :  { %v307_v50 = vadd.f32 %v305_v57, %v277_v30  ;;  %v903_v18 = vmul.f32 0.9801987, %v1807_v60  ;;  %v2792_v30 = vld [vmem:[#allocation10_spill] sm:$0xff] }
 0x153   :  { %821 = vrot.lane.b32.xlu1 %v804_v48, %s1969_s13  ;;  %v927_v32 = vsub.f32 %v2393_v31, %v2792_v30 }
 0x154   :  { %v333_v5 = vadd.f32 %v2386_v59, %v307_v50  ;;  %887 = vrot.lane.b32.xlu0 %v870_v13, %s1975_s18 }
 0x155   :  { %735 = vrot.lane.b32.xlu2 %v2322_v19, %s1977_s20  ;;  %v432_v28 = vpop.permute.xlu1 %431  ;;  %v2442_v19 = vld [vmem:[#allocation2 + $0xc] sm:$0xff] }
 0x156   :  { %v367_v4 = vadd.f32 %v362_v9, %v333_v5  ;;  %v500_v58 = vpop.permute.xlu0 %499  ;;  %v1809_v9 = vpop.eup %1808  ;;  %v2793_v5 = vld [vmem:[#allocation8_spill] sm:$0xff]  ;;  %v1052_v48 = vsub.f32 %v2442_v19, %v2389_v62 }
 0x157   :  { %v364_v55 = vpop.permute.xlu2 %363  ;;  %v1811_v49 = vpop.eup %1810  ;;  %v2451_v61 = vmul.f32 0.95599747, %v1809_v9  ;;  %v1017_v22 = vsub.f32 %v2423_v3, %v2793_v5 }
 0x158   :  { %v368_v39 = vadd.f32 %v364_v55, %v334_v51  ;;  %v401_v59 = vadd.f32 %v2223_v14, %v367_v4  ;;  %v2791_v14 = vld [vmem:[#allocation9_spill] sm:$0xff]  ;;  %v529_v50 = vmul.f32 0.95122945, %v1811_v49  ;;  %v1813_v4 = vpop.eup %1812  ;;  %v1054_v63 = vmul.f32 %v1052_v48, %v1052_v48 }
 0x159   :  { %v984_v6 = vsub.f32 %v2442_v19, %v2791_v14  ;;  %v940_v12 = vmul.f32 %v2389_v62, %v2451_v61  ;;  %v2468_v60 = vmul.f32 0.9753099, %v1813_v4  ;;  %v1085_v49 = vsub.f32 %v2423_v3, %v2091_v21 }
 0x15a   :  { %v402_v24 = vadd.f32 %v2239_v38, %v368_v39  ;;  %v435_v34 = vadd.f32 %v430_v40, %v401_v59  ;;  %v531_v39 = vmul.f32 %v529_v50, %v2169_v10 }
 0x15b   :  { %851 = vrot.lane.b32.xlu1 %v1805_v53, %s1970_s0  ;;  %v986_v57 = vmul.f32 %v984_v6, %v984_v6  ;;  %v995_v42 = vmul.f32 %v2468_v60, %v2423_v3  ;;  %v1056_v53 = vmul.f32 -50.0, %v1054_v63 }
 0x15c   :  { %v436_v51 = vadd.f32 %v432_v28, %v402_v24  ;;  %919 = vrot.lane.b32.xlu0 %v903_v18, %s1976_s19  ;;  %v929_v28 = vmul.f32 %v927_v32, %v927_v32 }
 0x15d   :  { %785 = vrot.lane.b32.xlu2 %v2341_v45, %s1971_s14  ;;  %v464_v16 = vpop.permute.xlu1 %463  ;;  %v527_v45 = vmul.f32 1.442695, %v524_v2  ;;  %v988_v47 = vmul.f32 -50.0, %v986_v57 }
 0x15e   :  { %v469_v38 = vadd.f32 %v464_v16, %v435_v34  ;;  %v554_v1 = vpop.permute.xlu0 %553  ;;  %v931_v24 = vmul.f32 -50.0, %v929_v28 }
 0x15f   :  { %v466_v40 = vpop.permute.xlu2 %465  ;;  %1814 = vpow2.f32 %v527_v45  ;;  %v991_v7 = vmul.f32 1.442695, %v988_v47 }
 0x160   :  { %v470_v56 = vadd.f32 %v466_v40, %v436_v51  ;;  %1816 = vpow2.f32 %v901_v17  ;;  %v905_v51 = vmul.f32 %v2393_v31, %v903_v18  ;;  %v933_v9 = vmul.f32 1.442695, %v931_v24 }
 0x161   :  { %1818 = vpow2.f32 %v991_v7 }
 0x162   :  { %v504_v11 = vadd.f32 %v500_v58, %v470_v56  ;;  %v1019_v58 = vmul.f32 %v1017_v22, %v1017_v22  ;;  %1820 = vpow2.f32 %v933_v9 }
 0x163   :  { %877 = vrot.lane.b32.xlu1 %v872_v15, %s1975_s18  ;;  %v1059_v15 = vmul.f32 1.442695, %v1056_v53 }
 0x164   :  { %945 = vrot.lane.b32.xlu0 %v940_v12, %s1977_s20 }
 0x165   :  { %811 = vrot.lane.b32.xlu2 %v806_v29, %s1969_s13  ;;  %v476_v37 = vpop.permute.xlu1 %475  ;;  %v1815_v6 = vpop.eup %1814 }
 0x166   :  { %v480_v13 = vadd.f32 %v476_v37, %v2409_v23  ;;  %v566_v33 = vpop.permute.xlu0 %565  ;;  %v1021_v23 = vmul.f32 -50.0, %v1019_v58  ;;  %v1817_v16 = vpop.eup %1816 }
 0x167   :  { %v498_v55 = vpop.permute.xlu2 %497  ;;  %v1819_v0 = vpop.eup %1818  ;;  %v904_v45 = vmul.f32 0.9801987, %v1817_v16 }
 0x168   :  { %v503_v59 = vadd.f32 %v498_v55, %v469_v38  ;;  %v530_v38 = vmul.f32 0.95122945, %v1815_v6  ;;  %v1023_v57 = vmul.f32 1.442695, %v1021_v23  ;;  %v994_v22 = vmul.f32 0.9753099, %v1819_v0  ;;  %v1821_v4 = vpop.eup %1820 }
 0x169   :  { %v937_v7 = vmul.f32 0.95599747, %v1821_v4  ;;  %v1051_v6 = vsub.f32 %v2423_v3, %v2393_v31 }
 0x16a   :  { %v533_v34 = vadd.f32 %v531_v39, %v503_v59  ;;  %v532_v29 = vmul.f32 %v530_v38, %v2186_v27  ;;  %1822 = vpow2.f32 %v1023_v57  ;;  %v1018_v39 = vsub.f32 %v2442_v19, %v2063_v52 }
 0x16b   :  { %909 = vrot.lane.b32.xlu1 %v905_v51, %s1976_s19  ;;  %1824 = vpow2.f32 %v1059_v15  ;;  %v996_v53 = vmul.f32 %v994_v22, %v2442_v19  ;;  %v939_v4 = vmul.f32 %v2393_v31, %v937_v7 }
 0x16c   :  { %v559_v10 = vadd.f32 %v554_v1, %v533_v34  ;;  %999 = vrot.lane.b32.xlu0 %v995_v42, %s1971_s14  ;;  %v534_v12 = vadd.f32 %v532_v29, %v504_v11  ;;  %v1086_v11 = vsub.f32 %v2442_v19, %v2077_v8 }
 0x16d   :  { %841 = vrot.lane.b32.xlu2 %v837_v26, %s1970_s0  ;;  %v508_v2 = vpop.permute.xlu1 %507  ;;  %v1020_v26 = vmul.f32 %v1018_v39, %v1018_v39 }
 0x16e   :  { %v513_v18 = vadd.f32 %v508_v2, %v2430_v20  ;;  %v598_v1 = vpop.permute.xlu0 %597  ;;  %v1087_v20 = vmul.f32 %v1085_v49, %v1085_v49  ;;  %v1088_v42 = vmul.f32 %v1086_v11, %v1086_v11 }
 0x16f   :  { %v510_v40 = vpop.permute.xlu2 %509  ;;  %v1022_v2 = vmul.f32 -50.0, %v1020_v26 }
 0x170   :  { %v514_v56 = vadd.f32 %v510_v40, %v480_v13  ;;  %v535_v28 = vadd.f32 %v529_v50, %v513_v18  ;;  %v1089_v27 = vmul.f32 -50.0, %v1087_v20  ;;  %v1823_v59 = vpop.eup %1822  ;;  %v906_v18 = vmul.f32 %v2389_v62, %v904_v45 }
 0x171   :  { %v1027_v50 = vmul.f32 0.99004984, %v1823_v59  ;;  %v1119_v40 = vsub.f32 %v2423_v3, %v2107_v41  ;;  %v1154_v20 = vsub.f32 %v2442_v19, %v2111_v46 }
 0x172   :  { %v536_v32 = vadd.f32 %v530_v38, %v514_v56  ;;  %v1090_v38 = vmul.f32 -50.0, %v1088_v42  ;;  %v1025_v56 = vmul.f32 1.442695, %v1022_v2 }
 0x173   :  { %921 = vrot.lane.b32.xlu1 %v904_v45, %s1976_s19  ;;  %v1121_v45 = vmul.f32 %v1119_v40, %v1119_v40 }
 0x174   :  { %v570_v47 = vadd.f32 %v566_v33, %v536_v32  ;;  %1011 = vrot.lane.b32.xlu0 %v994_v22, %s1971_s14  ;;  %v1825_v33 = vpop.eup %1824  ;;  %v1093_v29 = vmul.f32 1.442695, %v1090_v38 }
 0x175   :  { %853 = vrot.lane.b32.xlu2 %v2384_v44, %s1970_s0  ;;  %v556_v17 = vpop.permute.xlu1 %555  ;;  %v1091_v44 = vmul.f32 1.442695, %v1089_v27  ;;  %v2493_v63 = vmul.f32 0.99501246, %v1825_v33 }
 0x176   :  { %v560_v37 = vadd.f32 %v556_v17, %v534_v12  ;;  %v624_v55 = vpop.permute.xlu0 %623  ;;  %v1029_v17 = vmul.f32 %v1027_v50, %v2423_v3 }
 0x177   :  { %v564_v48 = vpop.permute.xlu2 %563  ;;  %1826 = vpow2.f32 %v1091_v44 }
 0x178   :  { %v569_v13 = vadd.f32 %v564_v48, %v535_v28  ;;  %1828 = vpow2.f32 %v1025_v56  ;;  %v1123_v48 = vmul.f32 -50.0, %v1121_v45 }
 0x179   :  { %1830 = vpow2.f32 %v1093_v29 }
 0x17a   :  { %v603_v58 = vadd.f32 %v598_v1, %v569_v13  ;;  %v1156_v13 = vmul.f32 %v1154_v20, %v1154_v20 }
 0x17b   :  { %953 = vrot.lane.b32.xlu1 %v937_v7, %s1977_s20 }
 0x17c   :  { %1043 = vrot.lane.b32.xlu0 %v1027_v50, %s1969_s13  ;;  %v1125_v50 = vmul.f32 1.442695, %v1123_v48  ;;  %v1158_v26 = vmul.f32 -50.0, %v1156_v13 }
 0x17d   :  { %885 = vrot.lane.b32.xlu2 %v2411_v54, %s1975_s18  ;;  %v588_v24 = vpop.permute.xlu1 %587  ;;  %v1064_v54 = vmul.f32 %v2493_v63, %v2442_v19  ;;  %v1827_v57 = vpop.eup %1826 }
 0x17e   :  { %v593_v34 = vadd.f32 %v588_v24, %v559_v10  ;;  %v656_v9 = vpop.permute.xlu0 %655  ;;  %v1053_v10 = vmul.f32 %v1051_v6, %v1051_v6  ;;  %v2508_v12 = vmul.f32 0.99004984, %v1827_v57  ;;  %v1829_v59 = vpop.eup %1828 }
 0x17f   :  { %v590_v51 = vpop.permute.xlu2 %589  ;;  %v1028_v6 = vmul.f32 0.99004984, %v1829_v59 }
 0x180   :  { %v594_v23 = vadd.f32 %v590_v51, %v560_v37  ;;  %v1055_v32 = vmul.f32 -50.0, %v1053_v10  ;;  %v1097_v27 = vmul.f32 %v2508_v12, %v2423_v3  ;;  %v1831_v51 = vpop.eup %1830 }
 0x182   :  { %v628_v16 = vadd.f32 %v624_v55, %v594_v23  ;;  %v1057_v37 = vmul.f32 1.442695, %v1055_v32  ;;  %v2518_v55 = vld [vmem:[#allocation2 + $0x5] sm:$0xff]  ;;  %v2533_v32 = vld [vmem:[#allocation2 + $0xd] sm:$0xff] }
 0x183   :  { %1001 = vrot.lane.b32.xlu1 %v996_v53, %s1971_s14  ;;  %v1209_v24 = vsub.f32 %v2518_v55, %v2046_v35  ;;  %v1096_v53 = vmul.f32 0.99004984, %v1831_v51  ;;  %v1210_v45 = vsub.f32 %v2533_v32, %v2791_v14 }
 0x184   :  { %1069 = vrot.lane.b32.xlu0 %v1064_v54, %s1970_s0  ;;  %1832 = vpow2.f32 %v1057_v37 }
 0x185   :  { %911 = vrot.lane.b32.xlu2 %v906_v18, %s1976_s19  ;;  %v600_v49 = vpop.permute.xlu1 %599  ;;  %1834 = vpow2.f32 %v1125_v50  ;;  %v742_v18 = vsub.f32 %v2389_v62, %v2057_v43 }
 0x186   :  { %v604_v1 = vadd.f32 %v600_v49, %v570_v47  ;;  %v668_v22 = vpop.permute.xlu0 %667  ;;  %v741_v47 = vsub.f32 %v2393_v31, %v2048_v36 }
 0x187   :  { %v622_v0 = vpop.permute.xlu2 %621  ;;  %v744_v29 = vmul.f32 %v742_v18, %v742_v18 }
 0x188   :  { %v627_v15 = vadd.f32 %v622_v0, %v593_v34  ;;  %v743_v44 = vmul.f32 %v741_v47, %v741_v47  ;;  %v1120_v0 = vsub.f32 %v2442_v19, %v2093_v25 }
 0x189   :  { %v746_v37 = vmul.f32 -50.0, %v744_v29 }
 0x18a   :  { %v661_v28 = vadd.f32 %v656_v9, %v627_v15  ;;  %v745_v42 = vmul.f32 -50.0, %v743_v44  ;;  %v1161_v9 = vmul.f32 1.442695, %v1158_v26  ;;  %v1833_v2 = vpop.eup %1832  ;;  %v1153_v44 = vsub.f32 %v2423_v3, %v2792_v30 }
 0x18b   :  { %1033 = vrot.lane.b32.xlu1 %v1029_v17, %s1969_s13  ;;  %v1061_v57 = vmul.f32 0.99501246, %v1833_v2  ;;  %v749_v50 = vmul.f32 1.442695, %v746_v37  ;;  %v1030_v26 = vmul.f32 %v1028_v6, %v2442_v19 }
 0x18c   :  { %1101 = vrot.lane.b32.xlu0 %v1097_v27, %s1975_s18  ;;  %v747_v40 = vmul.f32 1.442695, %v745_v42  ;;  %1836 = vpow2.f32 %v1161_v9  ;;  %v1212_v27 = vmul.f32 %v1210_v45, %v1210_v45  ;;  %v1155_v9 = vmul.f32 %v1153_v44, %v1153_v44 }
 0x18d   :  { %943 = vrot.lane.b32.xlu2 %v939_v4, %s1977_s20  ;;  %v632_v39 = vpop.permute.xlu1 %631 }
 0x18e   :  { %v637_v7 = vadd.f32 %v632_v39, %v603_v58  ;;  %v700_v34 = vpop.permute.xlu0 %699  ;;  %v1211_v58 = vmul.f32 %v1209_v24, %v1209_v24  ;;  %1838 = vpow2.f32 %v747_v40  ;;  %v1214_v24 = vmul.f32 -50.0, %v1212_v27 }
 0x18f   :  { %v634_v33 = vpop.permute.xlu2 %633 }
 0x190   :  { %v638_v11 = vadd.f32 %v634_v33, %v604_v1  ;;  %v1213_v49 = vmul.f32 -50.0, %v1211_v58 }
 0x192   :  { %v2523_v23 = vadd.f32 %v668_v22, %v638_v11  ;;  %v1122_v22 = vmul.f32 %v1120_v0, %v1120_v0  ;;  %v1098_v11 = vmul.f32 %v1096_v53, %v2442_v19  ;;  %v1157_v0 = vmul.f32 -50.0, %v1155_v9 }
 0x193   :  { %1045 = vrot.lane.b32.xlu1 %v1028_v6, %s1969_s13  ;;  %v1278_v6 = vsub.f32 %v2533_v32, %v2389_v62 }
 0x194   :  { %1113 = vrot.lane.b32.xlu0 %v1096_v53, %s1975_s18  ;;  %v1124_v33 = vmul.f32 -50.0, %v1122_v22 }
 0x195   :  { %955 = vrot.lane.b32.xlu2 %v2451_v61, %s1977_s20  ;;  %v658_v54 = vpop.permute.xlu1 %657  ;;  %v1835_v61 = vpop.eup %1834 }
 0x196   :  { %v662_v10 = vadd.f32 %v658_v54, %v628_v16  ;;  %v726_v1 = vpop.permute.xlu0 %725  ;;  %v1215_v16 = vmul.f32 1.442695, %v1213_v49  ;;  %v1129_v20 = vmul.f32 0.9753099, %v1835_v61  ;;  %v1837_v17 = vpop.eup %1836  ;;  %v1127_v42 = vmul.f32 1.442695, %v1124_v33 }
 0x197   :  { %v666_v38 = vpop.permute.xlu2 %665  ;;  %v1839_v39 = vpop.eup %1838 }
 0x198   :  { %v671_v56 = vadd.f32 %v666_v38, %v637_v7  ;;  %1840 = vpow2.f32 %v1215_v16  ;;  %v2543_v7 = vmul.f32 0.95122945, %v1837_v17  ;;  %v1217_v38 = vmul.f32 1.442695, %v1214_v24 }
 0x199   :  { %1842 = vpow2.f32 %v749_v50  ;;  %v1131_v29 = vmul.f32 %v1129_v20, %v2423_v3  ;;  %v1280_v16 = vmul.f32 %v1278_v6, %v1278_v6 }
 0x19a   :  { %v2535_v15 = vadd.f32 %v700_v34, %v671_v56  ;;  %v1243_v34 = vsub.f32 %v2518_v55, %v2793_v5  ;;  %v1166_v51 = vmul.f32 %v2543_v7, %v2442_v19  ;;  %1844 = vpow2.f32 %v1127_v42 }
 0x19b   :  { %1077 = vrot.lane.b32.xlu1 %v1061_v57, %s1970_s0  ;;  %1846 = vpow2.f32 %v1217_v38  ;;  %v1244_v38 = vsub.f32 %v2533_v32, %v2063_v52 }
 0x19c   :  { %1145 = vrot.lane.b32.xlu0 %v1129_v20, %s1976_s19  ;;  %v1245_v40 = vmul.f32 %v1243_v34, %v1243_v34 }
 0x19d   :  { %1009 = vrot.lane.b32.xlu2 %v2468_v60, %s1971_s14  ;;  %v690_v4 = vpop.permute.xlu1 %689 }
 0x19e   :  { %v695_v47 = vadd.f32 %v690_v4, %v661_v28  ;;  %v776_v59 = vpop.permute.xlu0 %775  ;;  %v751_v28 = vmul.f32 0.95599747, %v1839_v39  ;;  %v1841_v58 = vpop.eup %1840  ;;  %v1159_v4 = vmul.f32 1.442695, %v1157_v0 }
 0x19f   :  { %v692_v48 = vpop.permute.xlu2 %691  ;;  %v2560_v49 = vmul.f32 0.96078944, %v1841_v58  ;;  %v1843_v45 = vpop.eup %1842 }
 0x1a0   :  { %v696_v13 = vadd.f32 %v692_v48, %v662_v10  ;;  %v753_v18 = vmul.f32 %v2393_v31, %v751_v28  ;;  %v752_v48 = vmul.f32 0.95599747, %v1843_v45  ;;  %1848 = vpow2.f32 %v1159_v4 }
 0x1a1   :  { %v1221_v17 = vmul.f32 %v2560_v49, %v2518_v55 }
 0x1a2   :  { %v730_v60 = vadd.f32 %v726_v1, %v696_v13  ;;  %v1063_v1 = vmul.f32 %v1061_v57, %v2423_v3  ;;  %v1282_v57 = vmul.f32 -50.0, %v1280_v16  ;;  %v754_v24 = vmul.f32 %v2389_v62, %v752_v48 }
 0x1a3   :  { %1103 = vrot.lane.b32.xlu1 %v1098_v11, %s1975_s18 }
 0x1a4   :  { %1171 = vrot.lane.b32.xlu0 %v1166_v51, %s1977_s20  ;;  %v756_v42 = vadd.f32 %v754_v24, %v730_v60  ;;  %v1312_v60 = vsub.f32 %v2533_v32, %v2077_v8 }
 0x1a5   :  { %1035 = vrot.lane.b32.xlu2 %v1030_v26, %s1969_s13  ;;  %v702_v2 = vpop.permute.xlu1 %701  ;;  %v1285_v26 = vmul.f32 1.442695, %v1282_v57 }
 0x1a6   :  { %v706_v53 = vadd.f32 %v702_v2, %v2523_v23  ;;  %v788_v56 = vpop.permute.xlu0 %787  ;;  %v1247_v23 = vmul.f32 -50.0, %v1245_v40 }
 0x1a7   :  { %v724_v54 = vpop.permute.xlu2 %723 }
 0x1a8   :  { %v729_v10 = vadd.f32 %v724_v54, %v695_v47  ;;  %v1845_v47 = vpop.eup %1844  ;;  %v1249_v39 = vmul.f32 1.442695, %v1247_v23 }
 0x1a9   :  { %v1847_v44 = vpop.eup %1846  ;;  %v1130_v50 = vmul.f32 0.9753099, %v1845_v47 }
 0x1aa   :  { %v755_v61 = vadd.f32 %v753_v18, %v729_v10  ;;  %1850 = vpow2.f32 %v1249_v39  ;;  %v1220_v51 = vmul.f32 0.96078944, %v1847_v44  ;;  %v1849_v2 = vpop.eup %1848 }
 0x1ab   :  { %1135 = vrot.lane.b32.xlu1 %v1131_v29, %s1976_s19  ;;  %1852 = vpow2.f32 %v1285_v26 }
 0x1ac   :  { %v781_v22 = vadd.f32 %v776_v59, %v755_v61  ;;  %1225 = vrot.lane.b32.xlu0 %v1221_v17, %s1971_s14  ;;  %v1311_v59 = vsub.f32 %v2518_v55, %v2091_v21  ;;  %v1246_v61 = vmul.f32 %v1244_v38, %v1244_v38  ;;  %v1277_v17 = vsub.f32 %v2518_v55, %v2393_v31  ;;  %v2610_v38 = vld [vmem:[#allocation2 + $0x6] sm:$0xff] }
 0x1ad   :  { %1067 = vrot.lane.b32.xlu2 %v1063_v1, %s1970_s0  ;;  %v734_v37 = vpop.permute.xlu1 %733  ;;  %v1345_v31 = vsub.f32 %v2518_v55, %v2107_v41 }
 0x1ae   :  { %v739_v20 = vadd.f32 %v734_v37, %v2535_v15  ;;  %v820_v33 = vpop.permute.xlu0 %819  ;;  %v1313_v15 = vmul.f32 %v1311_v59, %v1311_v59  ;;  %v1314_v37 = vmul.f32 %v1312_v60, %v1312_v60  ;;  %v1248_v47 = vmul.f32 -50.0, %v1246_v61 }
 0x1af   :  { %v736_v13 = vpop.permute.xlu2 %735 }
 0x1b0   :  { %v740_v27 = vadd.f32 %v736_v13, %v706_v53  ;;  %v757_v58 = vadd.f32 %v751_v28, %v739_v20  ;;  %v1315_v18 = vmul.f32 -50.0, %v1313_v15  ;;  %v1851_v40 = vpop.eup %1850  ;;  %v1222_v20 = vmul.f32 %v1220_v51, %v2533_v32 }
 0x1b1   :  { %v1853_v0 = vpop.eup %1852  ;;  %v1253_v28 = vmul.f32 0.9753099, %v1851_v40  ;;  %v1132_v13 = vmul.f32 %v1130_v50, %v2442_v19  ;;  %v1251_v39 = vmul.f32 1.442695, %v1248_v47 }
 0x1b2   :  { %v758_v11 = vadd.f32 %v752_v48, %v740_v27  ;;  %v2585_v23 = vmul.f32 0.9801987, %v1853_v0  ;;  %v1316_v27 = vmul.f32 -50.0, %v1314_v37 }
 0x1b3   :  { %1147 = vrot.lane.b32.xlu1 %v1130_v50, %s1976_s19  ;;  %v1347_v50 = vmul.f32 %v1345_v31, %v1345_v31 }
 0x1b4   :  { %v792_v34 = vadd.f32 %v788_v56, %v758_v11  ;;  %1237 = vrot.lane.b32.xlu0 %v1220_v51, %s1971_s14  ;;  %v1163_v56 = vmul.f32 0.95122945, %v1849_v2  ;;  %v1319_v15 = vmul.f32 1.442695, %v1316_v27  ;;  %v1380_v51 = vsub.f32 %v2533_v32, %v2111_v46 }
 0x1b5   :  { %1079 = vrot.lane.b32.xlu2 %v2493_v63, %s1970_s0  ;;  %v778_v9 = vpop.permute.xlu1 %777  ;;  %v1317_v63 = vmul.f32 1.442695, %v1315_v18 }
 0x1b6   :  { %v782_v6 = vadd.f32 %v778_v9, %v756_v42  ;;  %v844_v10 = vpop.permute.xlu0 %843  ;;  %v1382_v18 = vmul.f32 %v1380_v51, %v1380_v51 }
 0x1b7   :  { %v786_v53 = vpop.permute.xlu2 %785  ;;  %1854 = vpow2.f32 %v1317_v63 }
 0x1b8   :  { %v791_v54 = vadd.f32 %v786_v53, %v757_v58  ;;  %1856 = vpow2.f32 %v1251_v39  ;;  %v1255_v58 = vmul.f32 %v1253_v28, %v2518_v55 }
 0x1b9   :  { %1858 = vpow2.f32 %v1319_v15 }
 0x1ba   :  { %v825_v1 = vadd.f32 %v820_v33, %v791_v54  ;;  %v1349_v54 = vmul.f32 -50.0, %v1347_v50 }
 0x1bb   :  { %1179 = vrot.lane.b32.xlu1 %v1163_v56, %s1977_s20 }
 0x1bc   :  { %1269 = vrot.lane.b32.xlu0 %v1253_v28, %s1969_s13  ;;  %v1351_v61 = vmul.f32 1.442695, %v1349_v54 }
 0x1bd   :  { %1111 = vrot.lane.b32.xlu2 %v2508_v12, %s1975_s18  ;;  %v810_v29 = vpop.permute.xlu1 %809  ;;  %v1290_v12 = vmul.f32 %v2585_v23, %v2533_v32  ;;  %v1855_v59 = vpop.eup %1854 }
 0x1be   :  { %v815_v16 = vadd.f32 %v810_v29, %v781_v22  ;;  %v876_v57 = vpop.permute.xlu0 %875  ;;  %v1279_v22 = vmul.f32 %v1277_v17, %v1277_v17  ;;  %v2600_v9 = vmul.f32 0.9753099, %v1855_v59  ;;  %v1857_v0 = vpop.eup %1856  ;;  %v1384_v29 = vmul.f32 -50.0, %v1382_v18 }
 0x1bf   :  { %v812_v45 = vpop.permute.xlu2 %811  ;;  %v1859_v17 = vpop.eup %1858 }
 0x1c0   :  { %v816_v4 = vadd.f32 %v812_v45, %v782_v6  ;;  %v1281_v26 = vmul.f32 -50.0, %v1279_v22  ;;  %v1165_v6 = vmul.f32 %v1163_v56, %v2423_v3  ;;  %v1387_v47 = vmul.f32 1.442695, %v1384_v29 }
 0x1c2   :  { %v848_v48 = vadd.f32 %v844_v10, %v816_v4  ;;  %v1283_v53 = vmul.f32 1.442695, %v1281_v26  ;;  %v1323_v10 = vmul.f32 %v2600_v9, %v2518_v55  ;;  %v1254_v4 = vmul.f32 0.9753099, %v1857_v0 }
 0x1c3   :  { %1227 = vrot.lane.b32.xlu1 %v1222_v20, %s1971_s14 }
 0x1c4   :  { %1295 = vrot.lane.b32.xlu0 %v1290_v12, %s1970_s0  ;;  %1860 = vpow2.f32 %v1283_v53  ;;  %v1322_v12 = vmul.f32 0.9753099, %v1859_v17 }
 0x1c5   :  { %1137 = vrot.lane.b32.xlu2 %v1132_v13, %s1976_s19  ;;  %v822_v33 = vpop.permute.xlu1 %821  ;;  %1862 = vpow2.f32 %v1351_v61  ;;  %v1256_v61 = vmul.f32 %v1254_v4, %v2533_v32 }
 0x1c6   :  { %v826_v44 = vadd.f32 %v822_v33, %v792_v34  ;;  %v888_v42 = vpop.permute.xlu0 %887  ;;  %v965_v34 = vsub.f32 %v2423_v3, %v2048_v36  ;;  %1864 = vpow2.f32 %v1387_v47 }
 0x1c7   :  { %v842_v11 = vpop.permute.xlu2 %841 }
 0x1c8   :  { %v847_v24 = vadd.f32 %v842_v11, %v815_v16  ;;  %v967_v60 = vmul.f32 %v965_v34, %v965_v34  ;;  %v1435_v16 = vsub.f32 %v2610_v38, %v2046_v35  ;;  %v966_v35 = vsub.f32 %v2442_v19, %v2057_v43 }
 0x1c9   :  { %v1346_v11 = vsub.f32 %v2533_v32, %v2093_v25 }
 0x1ca   :  { %v881_v2 = vadd.f32 %v876_v57, %v847_v24  ;;  %v969_v57 = vmul.f32 -50.0, %v967_v60  ;;  %v1861_v20 = vpop.eup %1860  ;;  %v1324_v60 = vmul.f32 %v1322_v12, %v2533_v32 }
 0x1cb   :  { %1259 = vrot.lane.b32.xlu1 %v1255_v58, %s1969_s13  ;;  %v1287_v59 = vmul.f32 0.9801987, %v1861_v20  ;;  %v1863_v26 = vpop.eup %1862  ;;  %v1348_v51 = vmul.f32 %v1346_v11, %v1346_v11 }
 0x1cc   :  { %1327 = vrot.lane.b32.xlu0 %v1323_v10, %s1975_s18  ;;  %v971_v31 = vmul.f32 1.442695, %v969_v57  ;;  %v1355_v50 = vmul.f32 0.96078944, %v1863_v26 }
 0x1cd   :  { %1169 = vrot.lane.b32.xlu2 %v1165_v6, %s1977_s20  ;;  %v852_v40 = vpop.permute.xlu1 %851 }
 0x1ce   :  { %v857_v56 = vadd.f32 %v852_v40, %v825_v1  ;;  %v920_v45 = vpop.permute.xlu0 %919  ;;  %v1437_v1 = vmul.f32 %v1435_v16, %v1435_v16  ;;  %1866 = vpow2.f32 %v971_v31  ;;  %v1289_v31 = vmul.f32 %v1287_v59, %v2518_v55 }
 0x1cf   :  { %v854_v63 = vpop.permute.xlu2 %853 }
 0x1d0   :  { %v858_v28 = vadd.f32 %v854_v63, %v826_v44  ;;  %v1439_v33 = vmul.f32 -50.0, %v1437_v1 }
 0x1d2   :  { %v2615_v37 = vadd.f32 %v888_v42, %v858_v28  ;;  %v1441_v15 = vmul.f32 1.442695, %v1439_v33  ;;  %v1865_v42 = vpop.eup %1864 }
 0x1d3   :  { %1271 = vrot.lane.b32.xlu1 %v1254_v4, %s1969_s13  ;;  %v2633_v0 = vmul.f32 0.93706745, %v1865_v42 }
 0x1d4   :  { %1339 = vrot.lane.b32.xlu0 %v1322_v12, %s1975_s18  ;;  %1868 = vpow2.f32 %v1441_v15  ;;  %v1867_v10 = vpop.eup %1866 }
 0x1d5   :  { %1181 = vrot.lane.b32.xlu2 %v2543_v7, %s1977_s20  ;;  %v878_v13 = vpop.permute.xlu1 %877  ;;  %v968_v7 = vmul.f32 %v966_v35, %v966_v35  ;;  %v975_v29 = vmul.f32 0.95122945, %v1867_v10 }
 0x1d6   :  { %v882_v22 = vadd.f32 %v878_v13, %v848_v48  ;;  %v946_v44 = vpop.permute.xlu0 %945  ;;  %v1469_v48 = vsub.f32 %v2610_v38, %v2793_v5  ;;  %v1350_v5 = vmul.f32 -50.0, %v1348_v51 }
 0x1d7   :  { %v886_v27 = vpop.permute.xlu2 %885  ;;  %v970_v6 = vmul.f32 -50.0, %v968_v7  ;;  %v977_v12 = vmul.f32 %v975_v29, %v2423_v3  ;;  %v1571_v3 = vsub.f32 %v2610_v38, %v2107_v41 }
 0x1d8   :  { %v891_v39 = vadd.f32 %v886_v27, %v857_v56  ;;  %v1471_v18 = vmul.f32 %v1469_v48, %v1469_v48  ;;  %v1379_v56 = vsub.f32 %v2518_v55, %v2792_v30  ;;  %v1353_v17 = vmul.f32 1.442695, %v1350_v5 }
 0x1d9   :  { %v973_v28 = vmul.f32 1.442695, %v970_v6 }
 0x1da   :  { %v2625_v24 = vadd.f32 %v920_v45, %v891_v39  ;;  %v1473_v16 = vmul.f32 -50.0, %v1471_v18  ;;  %v1392_v45 = vmul.f32 %v2633_v0, %v2533_v32  ;;  %v1381_v57 = vmul.f32 %v1379_v56, %v1379_v56  ;;  %v1869_v47 = vpop.eup %1868 }
 0x1db   :  { %1303 = vrot.lane.b32.xlu1 %v1287_v59, %s1970_s0  ;;  %1870 = vpow2.f32 %v973_v28  ;;  %v2650_v27 = vmul.f32 0.93706745, %v1869_v47 }
 0x1dc   :  { %1371 = vrot.lane.b32.xlu0 %v1355_v50, %s1976_s19  ;;  %v1475_v35 = vmul.f32 1.442695, %v1473_v16  ;;  %1872 = vpow2.f32 %v1353_v17  ;;  %v1383_v39 = vmul.f32 -50.0, %v1381_v57 }
 0x1dd   :  { %1235 = vrot.lane.b32.xlu2 %v2560_v49, %s1971_s14  ;;  %v910_v58 = vpop.permute.xlu1 %909  ;;  %v2637_v49 = vld [vmem:[#allocation2 + $0xe] sm:$0xff]  ;;  %v1447_v7 = vmul.f32 %v2650_v27, %v2610_v38 }
 0x1de   :  { %v915_v53 = vadd.f32 %v910_v58, %v881_v2  ;;  %v1000_v40 = vpop.permute.xlu0 %999  ;;  %v1504_v2 = vsub.f32 %v2637_v49, %v2389_v62  ;;  %1874 = vpow2.f32 %v1475_v35  ;;  %v1385_v59 = vmul.f32 1.442695, %v1383_v39 }
 0x1df   :  { %v912_v34 = vpop.permute.xlu2 %911  ;;  %v1470_v41 = vsub.f32 %v2637_v49, %v2063_v52 }
 0x1e0   :  { %v916_v54 = vadd.f32 %v912_v34, %v882_v22  ;;  %v1506_v20 = vmul.f32 %v1504_v2, %v1504_v2  ;;  %1876 = vpow2.f32 %v1385_v59 }
 0x1e1   :  { %v1871_v26 = vpop.eup %1870  ;;  %v1472_v52 = vmul.f32 %v1470_v41, %v1470_v41 }
 0x1e2   :  { %v950_v63 = vadd.f32 %v946_v44, %v916_v54  ;;  %v1357_v44 = vmul.f32 %v1355_v50, %v2518_v55  ;;  %v1508_v11 = vmul.f32 -50.0, %v1506_v20  ;;  %v1873_v51 = vpop.eup %1872  ;;  %v976_v42 = vmul.f32 0.95122945, %v1871_v26 }
 0x1e3   :  { %1329 = vrot.lane.b32.xlu1 %v1324_v60, %s1975_s18  ;;  %v1356_v10 = vmul.f32 0.96078944, %v1873_v51  ;;  %v1474_v20 = vmul.f32 -50.0, %v1472_v52 }
 0x1e4   :  { %1397 = vrot.lane.b32.xlu0 %v1392_v45, %s1977_s20  ;;  %v1511_v48 = vmul.f32 1.442695, %v1508_v11  ;;  %v1875_v54 = vpop.eup %1874  ;;  %v1572_v11 = vsub.f32 %v2637_v49, %v2093_v25 }
 0x1e5   :  { %1261 = vrot.lane.b32.xlu2 %v1256_v61, %s1969_s13  ;;  %v922_v1 = vpop.permute.xlu1 %921  ;;  %v2668_v60 = vmul.f32 0.95122945, %v1875_v54 }
 0x1e6   :  { %v926_v62 = vadd.f32 %v922_v1, %v2615_v37  ;;  %v1012_v22 = vpop.permute.xlu0 %1011  ;;  %1878 = vpow2.f32 %v1511_v48  ;;  %v1877_v16 = vpop.eup %1876 }
 0x1e7   :  { %v944_v4 = vpop.permute.xlu2 %943 }
 0x1e8   :  { %v949_v13 = vadd.f32 %v944_v4, %v915_v53  ;;  %v1573_v53 = vmul.f32 %v1571_v3, %v1571_v3 }
 0x1ea   :  { %v979_v33 = vadd.f32 %v977_v12, %v949_v13  ;;  %v1575_v5 = vmul.f32 -50.0, %v1573_v53  ;;  %v1477_v12 = vmul.f32 1.442695, %v1474_v20 }
 0x1eb   :  { %1361 = vrot.lane.b32.xlu1 %v1357_v44, %s1976_s19 }
 0x1ec   :  { %v1005_v37 = vadd.f32 %v1000_v40, %v979_v33  ;;  %1451 = vrot.lane.b32.xlu0 %v1447_v7, %s1971_s14  ;;  %v978_v40 = vmul.f32 %v976_v42, %v2442_v19  ;;  %v1879_v17 = vpop.eup %1878  ;;  %v1577_v47 = vmul.f32 1.442695, %v1575_v5  ;;  %v1358_v7 = vmul.f32 %v1356_v10, %v2533_v32 }
 0x1ed   :  { %1293 = vrot.lane.b32.xlu2 %v1289_v31, %s1970_s0  ;;  %v954_v15 = vpop.permute.xlu1 %953  ;;  %v2676_v4 = vmul.f32 0.95599747, %v1879_v17 }
 0x1ee   :  { %v959_v50 = vadd.f32 %v954_v15, %v2625_v24  ;;  %v1044_v34 = vpop.permute.xlu0 %1043  ;;  %v1606_v24 = vsub.f32 %v2637_v49, %v2111_v46  ;;  %v980_v28 = vadd.f32 %v978_v40, %v950_v63  ;;  %1880 = vpow2.f32 %v1577_v47 }
 0x1ef   :  { %v956_v58 = vpop.permute.xlu2 %955  ;;  %1882 = vpow2.f32 %v1477_v12  ;;  %v1574_v15 = vmul.f32 %v1572_v11, %v1572_v11  ;;  %v1191_v40 = vsub.f32 %v2518_v55, %v2048_v36  ;;  %v1538_v47 = vsub.f32 %v2637_v49, %v2077_v8 }
 0x1f0   :  { %v960_v6 = vadd.f32 %v956_v58, %v926_v62  ;;  %v981_v61 = vadd.f32 %v975_v29, %v959_v50  ;;  %v1608_v1 = vmul.f32 %v1606_v24, %v1606_v24  ;;  %v1537_v62 = vsub.f32 %v2610_v38, %v2091_v21  ;;  %v1913_v58 = vld [vmem:[#allocation2 + $0x3] sm:$0xff] }
 0x1f1   :  { %v1576_v53 = vmul.f32 -50.0, %v1574_v15  ;;  %v1192_v12 = vsub.f32 %v2533_v32, %v2057_v43 }
 0x1f2   :  { %v982_v18 = vadd.f32 %v976_v42, %v960_v6  ;;  %v1610_v29 = vmul.f32 -50.0, %v1608_v1  ;;  %v1539_v13 = vmul.f32 %v1537_v62, %v1537_v62  ;;  %v1503_v6 = vsub.f32 %v2610_v38, %v1913_v58 }
 0x1f3   :  { %1373 = vrot.lane.b32.xlu1 %v1356_v10, %s1976_s19  ;;  %v1579_v24 = vmul.f32 1.442695, %v1576_v53 }
 0x1f4   :  { %v1016_v56 = vadd.f32 %v1012_v22, %v982_v18  ;;  %1495 = vrot.lane.b32.xlu0 %v2668_v60, %s1969_s13  ;;  %v1613_v39 = vmul.f32 1.442695, %v1610_v29  ;;  %v1541_v44 = vmul.f32 -50.0, %v1539_v13  ;;  %v1881_v26 = vpop.eup %1880  ;;  %v1505_v5 = vmul.f32 %v1503_v6, %v1503_v6 }
 0x1f5   :  { %1305 = vrot.lane.b32.xlu2 %v2585_v23, %s1970_s0  ;;  %v1002_v2 = vpop.permute.xlu1 %1001  ;;  %v1389_v23 = vmul.f32 0.93706745, %v1877_v16  ;;  %v1883_v25 = vpop.eup %1882 }
 0x1f6   :  { %v1006_v19 = vadd.f32 %v1002_v2, %v980_v28  ;;  %v1070_v46 = vpop.permute.xlu0 %1069  ;;  %1884 = vpow2.f32 %v1613_v39  ;;  %v1543_v59 = vmul.f32 1.442695, %v1541_v44  ;;  %v1480_v41 = vmul.f32 0.95122945, %v1883_v25 }
 0x1f7   :  { %v1010_v45 = vpop.permute.xlu2 %1009  ;;  %v1391_v10 = vmul.f32 %v1389_v23, %v2518_v55  ;;  %v1507_v17 = vmul.f32 -50.0, %v1505_v5 }
 0x1f8   :  { %v1015_v57 = vadd.f32 %v1010_v45, %v981_v61  ;;  %1886 = vpow2.f32 %v1543_v59 }
 0x1f9   :  { %1888 = vpow2.f32 %v1579_v24  ;;  %v1509_v62 = vmul.f32 1.442695, %v1507_v17 }
 0x1fa   :  { %v1049_v63 = vadd.f32 %v1044_v34, %v1015_v57 }
 0x1fb   :  { %1405 = vrot.lane.b32.xlu1 %v1389_v23, %s1977_s20  ;;  %v1482_v23 = vmul.f32 %v1480_v41, %v2637_v49 }
 0x1fc   :  { %1531 = vrot.lane.b32.xlu0 %v2676_v4, %s1970_s0  ;;  %v1885_v34 = vpop.eup %1884 }
 0x1fd   :  { %1337 = vrot.lane.b32.xlu2 %v2600_v9, %s1975_s18  ;;  %v1034_v35 = vpop.permute.xlu1 %1033  ;;  %v1436_v9 = vsub.f32 %v2637_v49, %v2791_v14 }
 0x1fe   :  { %v1039_v22 = vadd.f32 %v1034_v35, %v1005_v37  ;;  %v1102_v33 = vpop.permute.xlu0 %1101  ;;  %v2690_v37 = vmul.f32 0.93706745, %v1881_v26  ;;  %v1887_v2 = vpop.eup %1886  ;;  %v1194_v26 = vmul.f32 %v1192_v12, %v1192_v12 }
 0x1ff   :  { %v1036_v31 = vpop.permute.xlu2 %1035  ;;  %v1438_v51 = vmul.f32 %v1436_v9, %v1436_v9  ;;  %v1547_v1 = vmul.f32 0.95122945, %v1887_v2  ;;  %v1889_v13 = vpop.eup %1888 }
 0x200   :  { %v1040_v21 = vadd.f32 %v1036_v31, %v1006_v19  ;;  %v1193_v19 = vmul.f32 %v1191_v40, %v1191_v40  ;;  %v1582_v44 = vmul.f32 0.93706745, %v1889_v13 }
 0x201   :  { %v1440_v54 = vmul.f32 -50.0, %v1438_v51 }
 0x202   :  { %v1074_v3 = vadd.f32 %v1070_v46, %v1040_v21  ;;  %v1195_v20 = vmul.f32 -50.0, %v1193_v19 }
 0x203   :  { %1461 = vrot.lane.b32.xlu1 %v2650_v27, %s1971_s14  ;;  %v1443_v52 = vmul.f32 1.442695, %v1440_v54  ;;  %v1584_v54 = vmul.f32 %v1582_v44, %v2637_v49 }
 0x204   :  { %1597 = vrot.lane.b32.xlu0 %v2690_v37, %s1976_s19 }
 0x205   :  { %1363 = vrot.lane.b32.xlu2 %v1358_v7, %s1976_s19  ;;  %v1046_v48 = vpop.permute.xlu1 %1045  ;;  %1890 = vpow2.f32 %v1443_v52  ;;  %v1549_v7 = vmul.f32 %v1547_v1, %v2610_v38 }
 0x206   :  { %v1050_v50 = vadd.f32 %v1046_v48, %v1016_v56  ;;  %v1114_v27 = vpop.permute.xlu0 %1113  ;;  %v2700_v56 = vmul.f32 0.9139312, %v1885_v34  ;;  %1892 = vpow2.f32 %v1509_v62  ;;  %v1196_v48 = vmul.f32 -50.0, %v1194_v26 }
 0x207   :  { %v1068_v14 = vpop.permute.xlu2 %1067  ;;  %v1481_v26 = vmul.f32 %v2668_v60, %v2610_v38 }
 0x208   :  { %v1073_v42 = vadd.f32 %v1068_v14, %v1039_v22  ;;  %v1197_v22 = vmul.f32 1.442695, %v1195_v20  ;;  %v1199_v53 = vmul.f32 1.442695, %v1196_v48 }
 0x20a   :  { %v1107_v18 = vadd.f32 %v1102_v33, %v1073_v42  ;;  %1894 = vpow2.f32 %v1197_v22 }
 0x20b   :  { %1497 = vrot.lane.b32.xlu1 %v1480_v41, %s1969_s13  ;;  %v1891_v31 = vpop.eup %1890 }
 0x20c   :  { %1633 = vrot.lane.b32.xlu0 %v2700_v56, %s1977_s20  ;;  %v1446_v9 = vmul.f32 0.93706745, %v1891_v31  ;;  %v1893_v59 = vpop.eup %1892 }
 0x20d   :  { %1395 = vrot.lane.b32.xlu2 %v1391_v10, %s1977_s20  ;;  %v1078_v28 = vpop.permute.xlu1 %1077  ;;  %v1513_v58 = vmul.f32 0.95599747, %v1893_v59  ;;  %v1516_v59 = vmul.f32 %v2676_v4, %v2637_v49  ;;  %v1618_v4 = vmul.f32 %v2700_v56, %v2637_v49  ;;  %v1418_v56 = vsub.f32 %v2637_v49, %v2057_v43 }
 0x20e   :  { %v1083_v61 = vadd.f32 %v1078_v28, %v1049_v63  ;;  %v1146_v57 = vpop.permute.xlu0 %1145  ;;  %v1540_v63 = vmul.f32 %v1538_v47, %v1538_v47 }
 0x20f   :  { %v1080_v16 = vpop.permute.xlu2 %1079  ;;  %v1515_v2 = vmul.f32 %v1513_v58, %v2610_v38 }
 0x210   :  { %v1084_v45 = vadd.f32 %v1080_v16, %v1050_v50  ;;  %v1542_v33 = vmul.f32 -50.0, %v1540_v63  ;;  %v1895_v42 = vpop.eup %1894 }
 0x211   :  { %v1201_v41 = vmul.f32 0.93706745, %v1895_v42  ;;  %v1583_v42 = vmul.f32 %v2690_v37, %v2610_v38 }
 0x212   :  { %v1118_v46 = vadd.f32 %v1114_v27, %v1084_v45  ;;  %v1448_v27 = vmul.f32 %v1446_v9, %v2637_v49 }
 0x213   :  { %1563 = vrot.lane.b32.xlu1 %v1547_v1, %s1975_s18  ;;  %v1203_v28 = vmul.f32 %v1201_v41, %v2518_v55 }
 0x214   :  { %1487 = vrot.lane.b32.xlu0 %v1482_v23, %s1969_s13 }
 0x215   :  { %1407 = vrot.lane.b32.xlu2 %v2633_v0, %s1977_s20  ;;  %v1104_v29 = vpop.permute.xlu1 %1103  ;;  %v1605_v0 = vsub.f32 %v2610_v38, %v2792_v30 }
 0x216   :  { %v1108_v8 = vadd.f32 %v1104_v29, %v1074_v3  ;;  %v1172_v39 = vpop.permute.xlu0 %1171  ;;  %v1545_v3 = vmul.f32 1.442695, %v1542_v33 }
 0x217   :  { %v1112_v35 = vpop.permute.xlu2 %1111  ;;  %v1607_v51 = vmul.f32 %v1605_v0, %v1605_v0 }
 0x218   :  { %v1117_v21 = vadd.f32 %v1112_v35, %v1083_v61  ;;  %1896 = vpow2.f32 %v1545_v3 }
 0x219   :  { %v1609_v34 = vmul.f32 -50.0, %v1607_v51  ;;  %1898 = vpow2.f32 %v1199_v53 }
 0x21a   :  { %v1151_v11 = vadd.f32 %v1146_v57, %v1117_v21 }
 0x21b   :  { %1599 = vrot.lane.b32.xlu1 %v1582_v44, %s1976_s19 }
 0x21c   :  { %1553 = vrot.lane.b32.xlu0 %v1549_v7, %s1975_s18 }
 0x21d   :  { %1463 = vrot.lane.b32.xlu2 %v1446_v9, %s1971_s14  ;;  %v1136_v15 = vpop.permute.xlu1 %1135 }
 0x21e   :  { %v1141_v25 = vadd.f32 %v1136_v15, %v1107_v18  ;;  %v1226_v30 = vpop.permute.xlu0 %1225  ;;  %v1611_v18 = vmul.f32 1.442695, %v1609_v34  ;;  %v1897_v40 = vpop.eup %1896 }
 0x21f   :  { %v1138_v50 = vpop.permute.xlu2 %1137  ;;  %v1548_v19 = vmul.f32 0.95122945, %v1897_v40  ;;  %v1899_v45 = vpop.eup %1898  ;;  %v1417_v40 = vsub.f32 %v2610_v38, %v2048_v36 }
 0x220   :  { %v1142_v14 = vadd.f32 %v1138_v50, %v1108_v8  ;;  %1900 = vpow2.f32 %v1611_v18  ;;  %v1202_v1 = vmul.f32 0.93706745, %v1899_v45 }
 0x221   :  { %v1550_v63 = vmul.f32 %v1548_v19, %v2637_v49 }
 0x222   :  { %v1176_v6 = vadd.f32 %v1172_v39, %v1142_v14  ;;  %v1204_v12 = vmul.f32 %v1202_v1, %v2533_v32 }
 0x223   :  { %1453 = vrot.lane.b32.xlu1 %v1448_v27, %s1971_s14 }
 0x224   :  { %1589 = vrot.lane.b32.xlu0 %v1584_v54, %s1976_s19  ;;  %v1206_v8 = vadd.f32 %v1204_v12, %v1176_v6 }
 0x225   :  { %1529 = vrot.lane.b32.xlu2 %v1513_v58, %s1970_s0  ;;  %v1148_v10 = vpop.permute.xlu1 %1147 }
 0x226   :  { %v1152_v5 = vadd.f32 %v1148_v10, %v1118_v46  ;;  %v1238_v61 = vpop.permute.xlu0 %1237  ;;  %v1901_v20 = vpop.eup %1900 }
 0x227   :  { %v1170_v24 = vpop.permute.xlu2 %1169  ;;  %v1615_v29 = vmul.f32 0.9139312, %v1901_v20 }
 0x228   :  { %v1175_v52 = vadd.f32 %v1170_v24, %v1141_v25 }
 0x229   :  { %v1617_v44 = vmul.f32 %v1615_v29, %v2610_v38 }
 0x22a   :  { %v1205_v16 = vadd.f32 %v1203_v28, %v1175_v52  ;;  %v1419_v52 = vmul.f32 %v1417_v40, %v1417_v40 }
 0x22b   :  { %1519 = vrot.lane.b32.xlu1 %v1515_v2, %s1970_s0  ;;  %v1420_v2 = vmul.f32 %v1418_v56, %v1418_v56 }
 0x22c   :  { %v1231_v17 = vadd.f32 %v1226_v30, %v1205_v16 }
 0x22d   :  { %1565 = vrot.lane.b32.xlu2 %v1548_v19, %s1975_s18  ;;  %v1180_v57 = vpop.permute.xlu1 %1179  ;;  %v1422_v45 = vmul.f32 -50.0, %v1420_v2 }
 0x22e   :  { %v1185_v47 = vadd.f32 %v1180_v57, %v1151_v11  ;;  %v1270_v55 = vpop.permute.xlu0 %1269 }
 0x22f   :  { %v1182_v46 = vpop.permute.xlu2 %1181 }
 0x230   :  { %v1186_v62 = vadd.f32 %v1182_v46, %v1152_v5  ;;  %v1207_v22 = vadd.f32 %v1201_v41, %v1185_v47 }
 0x232   :  { %v1208_v23 = vadd.f32 %v1202_v1, %v1186_v62  ;;  %v1425_v1 = vmul.f32 1.442695, %v1422_v45 }
 0x233   :  { %1555 = vrot.lane.b32.xlu1 %v1550_v63, %s1975_s18 }
 0x234   :  { %v1242_v13 = vadd.f32 %v1238_v61, %v1208_v23  ;;  %v1421_v61 = vmul.f32 -50.0, %v1419_v52 }
 0x235   :  { %1631 = vrot.lane.b32.xlu2 %v1615_v29, %s1977_s20  ;;  %v1228_v35 = vpop.permute.xlu1 %1227 }
 0x236   :  { %v1232_v31 = vadd.f32 %v1228_v35, %v1206_v8  ;;  %v1296_v33 = vpop.permute.xlu0 %1295  ;;  %v1423_v57 = vmul.f32 1.442695, %v1421_v61 }
 0x237   :  { %v1236_v21 = vpop.permute.xlu2 %1235 }
 0x238   :  { %v1241_v39 = vadd.f32 %v1236_v21, %v1207_v22  ;;  %1902 = vpow2.f32 %v1423_v57 }
 0x239   :  { %1904 = vpow2.f32 %v1425_v1 }
 0x23a   :  { %v1275_v11 = vadd.f32 %v1270_v55, %v1241_v39 }
 0x23b   :  { %1621 = vrot.lane.b32.xlu1 %v1617_v44, %s1977_s20 }
 0x23d   :  { %1485 = vrot.lane.b32.xlu2 %v1481_v26, %s1969_s13  ;;  %v1260_v32 = vpop.permute.xlu1 %1259 }
 0x23e   :  { %v1265_v0 = vadd.f32 %v1260_v32, %v1231_v17  ;;  %v1328_v3 = vpop.permute.xlu0 %1327  ;;  %v1903_v23 = vpop.eup %1902 }
 0x23f   :  { %v1262_v9 = vpop.permute.xlu2 %1261  ;;  %v1427_v8 = vmul.f32 0.9139312, %v1903_v23 }
 0x240   :  { %v1266_v7 = vadd.f32 %v1262_v9, %v1232_v31 }
 0x242   :  { %v1300_v15 = vadd.f32 %v1296_v33, %v1266_v7 }
 0x245   :  { %1521 = vrot.lane.b32.xlu2 %v1516_v59, %s1970_s0  ;;  %v1272_v48 = vpop.permute.xlu1 %1271 }
 0x246   :  { %v1276_v51 = vadd.f32 %v1272_v48, %v1242_v13  ;;  %v1340_v60 = vpop.permute.xlu0 %1339  ;;  %v1905_v13 = vpop.eup %1904 }
 0x247   :  { %v1294_v25 = vpop.permute.xlu2 %1293  ;;  %v1428_v39 = vmul.f32 0.9139312, %v1905_v13 }
 0x248   :  { %v1299_v50 = vadd.f32 %v1294_v25, %v1265_v0 }
 0x24a   :  { %v1333_v14 = vadd.f32 %v1328_v3, %v1299_v50 }
 0x24d   :  { %1587 = vrot.lane.b32.xlu2 %v1583_v42, %s1976_s19  ;;  %v1304_v30 = vpop.permute.xlu1 %1303 }
 0x24e   :  { %v1372_v6 = vpop.permute.xlu0 %1371  ;;  %v1309_v47 = vadd.f32 %v1304_v30, %v1275_v11 }
 0x24f   :  { %v1306_v58 = vpop.permute.xlu2 %1305 }
 0x250   :  { %v1310_v20 = vadd.f32 %v1306_v58, %v1276_v51 }
 0x252   :  { %v1344_v63 = vadd.f32 %v1340_v60, %v1310_v20 }
 0x255   :  { %1623 = vrot.lane.b32.xlu2 %v1618_v4, %s1977_s20  ;;  %v1330_v27 = vpop.permute.xlu1 %1329 }
 0x256   :  { %v1334_v53 = vadd.f32 %v1330_v27, %v1300_v15  ;;  %v2747_v41 = vpop.permute.xlu0 %1397 }
 0x257   :  { %v1338_v34 = vpop.permute.xlu2 %1337 }
 0x258   :  { %v1343_v46 = vadd.f32 %v1338_v34, %v1309_v47 }
 0x25a   :  { %v1377_v55 = vadd.f32 %v1372_v6, %v1343_v46 }
 0x25d   :  { %v1362_v54 = vpop.permute.xlu1 %1361 }
 0x25e   :  { %v2749_v10 = vadd.f32 %v1362_v54, %v1333_v14  ;;  %v2753_v24 = vpop.permute.xlu0 %1451 }
 0x25f   :  { %v1364_v18 = vpop.permute.xlu2 %1363 }
 0x260   :  { %v1368_v37 = vadd.f32 %v1364_v18, %v1334_v53  ;;  %v1429_v18 = vmul.f32 %v1427_v8, %v2610_v38 }
 0x262   :  { %v1402_v54 = vadd.f32 %v2747_v41, %v1368_v37 }
 0x265   :  { %v1374_v5 = vpop.permute.xlu1 %1373 }
 0x266   :  { %v1496_v17 = vpop.permute.xlu0 %1495  ;;  %v1378_v12 = vadd.f32 %v1374_v5, %v1344_v63  ;;  %v1430_v5 = vmul.f32 %v1428_v39, %v2637_v49 }
 0x267   :  { %v1396_v28 = vpop.permute.xlu2 %1395 }
 0x268   :  { %v1401_v34 = vadd.f32 %v1396_v28, %v2749_v10 }
 0x26a   :  { %v1431_v2 = vadd.f32 %v1429_v18, %v1401_v34 }
 0x26c   :  { %v1457_v47 = vadd.f32 %v2753_v24, %v1431_v2 }
 0x26d   :  { %v1406_v16 = vpop.permute.xlu1 %1405 }
 0x26e   :  { %v1532_v43 = vpop.permute.xlu0 %1531  ;;  %v1411_v29 = vadd.f32 %v1406_v16, %v1377_v55  ;;  %v1432_v16 = vadd.f32 %v1430_v5, %v1402_v54 }
 0x26f   :  { %v1408_v19 = vpop.permute.xlu2 %1407 }
 0x270   :  { %v1412_v22 = vadd.f32 %v1408_v19, %v1378_v12  ;;  %v1433_v21 = vadd.f32 %v1427_v8, %v1411_v29 }
 0x272   :  { %v1434_v44 = vadd.f32 %v1428_v39, %v1412_v22 }
 0x275   :  { %v1462_v36 = vpop.permute.xlu1 %1461 }
 0x276   :  { %v1467_v33 = vadd.f32 %v1462_v36, %v1433_v21  ;;  %v1598_v11 = vpop.permute.xlu0 %1597 }
 0x277   :  { %v1464_v62 = vpop.permute.xlu2 %1463 }
 0x278   :  { %v1468_v26 = vadd.f32 %v1464_v62, %v1434_v44  ;;  %v1501_v32 = vadd.f32 %v1496_v17, %v1467_v33 }
 0x27d   :  { %v1498_v35 = vpop.permute.xlu1 %1497 }
 0x27e   :  { %v1502_v9 = vadd.f32 %v1498_v35, %v1468_v26  ;;  %v1634_v50 = vpop.permute.xlu0 %1633 }
 0x27f   :  { %v1530_v31 = vpop.permute.xlu2 %1529 }
 0x280   :  { %v1535_v3 = vadd.f32 %v1530_v31, %v1501_v32  ;;  %v1536_v15 = vadd.f32 %v1532_v43, %v1502_v9 }
 0x285   :  { %v1564_v0 = vpop.permute.xlu1 %1563 }
 0x286   :  { %v1569_v59 = vadd.f32 %v1564_v0, %v1535_v3  ;;  %v1488_v4 = vpop.permute.xlu0 %1487 }
 0x287   :  { %v1566_v7 = vpop.permute.xlu2 %1565 }
 0x288   :  { %v1570_v48 = vadd.f32 %v1566_v7, %v1536_v15  ;;  %v1603_v25 = vadd.f32 %v1598_v11, %v1569_v59 }
 0x28d   :  { %v1600_v51 = vpop.permute.xlu1 %1599 }
 0x28e   :  { %v1604_v60 = vadd.f32 %v1600_v51, %v1570_v48  ;;  %v1554_v57 = vpop.permute.xlu0 %1553 }
 0x28f   :  { %v1632_v14 = vpop.permute.xlu2 %1631 }
 0x290   :  { %v1637_v42 = vadd.f32 %v1632_v14, %v1603_v25  ;;  %v1638_v30 = vadd.f32 %v1634_v50, %v1604_v60 }
 0x292   :  { %1906 = vrcp.f32 %v1637_v42  ;;  %v1650_v62 = vand.u32 2147483648, %v1637_v42  ;;  %vm1644_vm2 = vweird.f32 %v1637_v42  ;;  %v1648_v63 = vand.u32 2147483647, %v1637_v42 }
 0x293   :  { %1908 = vrcp.f32 %v1638_v30  ;;  %v1665_v43 = vand.u32 2147483648, %v1638_v30  ;;  %vm1659_vm4 = vweird.f32 %v1638_v30  ;;  %v1663_v29 = vand.u32 2147483647, %v1638_v30 }
 0x294   :  { %v1651_v31 = vor.u32 1.1754944e-38, %v1650_v62  ;;  %vm1649_vm6 = vcmp.eq.f32.partialorder %v1648_v63, 8.507059e+37 }
 0x295   :  { %v1454_v58 = vpop.permute.xlu1 %1453  ;;  %v1666_v44 = vor.u32 1.1754944e-38, %v1665_v43  ;;  %vm1664_vm7 = vcmp.eq.f32.partialorder %v1663_v29, 8.507059e+37 }
 0x296   :  { %v1458_v45 = vadd.f32 %v1454_v58, %v1432_v16  ;;  %v1590_v12 = vpop.permute.xlu0 %1589 }
 0x297   :  { %v1486_v6 = vpop.permute.xlu2 %1485 }
 0x298   :  { %v1907_v27 = vpop.eup %1906  ;;  %v1491_v1 = vadd.f32 %v1486_v6, %v1457_v47  ;;  %v1492_v28 = vadd.f32 %v1488_v4, %v1458_v45 }
 0x299   :  { %v1909_v53 = vpop.eup %1908  ;;  %v1640_v40 = vmul.f32 %v1907_v27, %v1637_v42  ;;  %vm1645_vm0 = vweird.f32 %v1907_v27 }
 0x29a   :  { %v1655_v52 = vmul.f32 %v1909_v53, %v1638_v30  ;;  %vm1660_vm1 = vweird.f32 %v1909_v53  ;;  %vm2762_vm3 = vmor %vm1644_vm2, %vm1645_vm0 }
 0x29b   :  { %v1641_v19 = vsub.f32 1.0, %v1640_v40  ;;  %vm2768_vm5 = vmor %vm1659_vm4, %vm1660_vm1 }
 0x29c   :  { %v1656_v17 = vsub.f32 1.0, %v1655_v52 }
 0x29d   :  { %v1520_v56 = vpop.permute.xlu1 %1519  ;;  %v1642_v10 = vmul.f32 %v1907_v27, %v1641_v19 }
 0x29e   :  { %v1657_v37 = vmul.f32 %v1909_v53, %v1656_v17  ;;  %v1525_v38 = vadd.f32 %v1520_v56, %v1491_v1 }
 0x29f   :  { %v1522_v61 = vpop.permute.xlu2 %1521  ;;  %v1643_v49 = vadd.f32 %v1907_v27, %v1642_v10 }
 0x2a0   :  { %v1526_v36 = vadd.f32 %v1522_v61, %v1492_v28  ;;  %v1658_v55 = vadd.f32 %v1909_v53, %v1657_v37  ;;  %v1559_v23 = vadd.f32 %v1554_v57, %v1525_v38 }
 0x2a1   :  { %v1647_v8 = vsel %vm2762_vm3, %v1907_v27, %v1643_v49 }
 0x2a2   :  { %v1662_v39 = vsel %vm2768_vm5, %v1909_v53, %v1658_v55  ;;  %v1652_v26 = vsel %vm1649_vm6, %v1651_v31, %v1647_v8 }
 0x2a3   :  { %v1667_v9 = vsel %vm1664_vm7, %v1666_v44, %v1662_v39 }
 0x2a5   :  { %v1556_v41 = vpop.permute.xlu1 %1555 }
 0x2a6   :  { %v1560_v20 = vadd.f32 %v1556_v41, %v1526_v36 }
 0x2a7   :  { %v1588_v46 = vpop.permute.xlu2 %1587 }
 0x2a8   :  { %v1593_v13 = vadd.f32 %v1588_v46, %v1559_v23  ;;  %v1594_v21 = vadd.f32 %v1590_v12, %v1560_v20 }
 0x2ad   :  { %v1622_v22 = vpop.permute.xlu1 %1621 }
 0x2ae   :  { %v1627_v33 = vadd.f32 %v1622_v22, %v1593_v13 }
 0x2af   :  { %v1624_v11 = vpop.permute.xlu2 %1623 }
 0x2b0   :  { %v1628_v32 = vadd.f32 %v1624_v11, %v1594_v21  ;;  %v1653_v0 = vmul.f32 %v1652_v26, %v1627_v33 }
 0x2b2   :  { %v1668_v7 = vmul.f32 %v1667_v9, %v1628_v32  ;;  %1670 = vst.msk [vmem:[#allocation5] sm:$0xff] %vm1669_vm8, %v1653_v0 }
 0x2b4   :  { %1671 = vst.msk [vmem:[#allocation5 + $0x8] sm:$0xff] %vm1669_vm8, %v1668_v7 }
 0x2b5   :  { %1684 = dma.vmem_to_hbm [thread:$0]  %s1677_s22, 256, %s1679_s25, [#allocation4], %s1967_s11, %s1967_s11, %s1968_s12  }
 0x2b6   :  { %1964 = dma.done.wait [#allocation4], 256  }
 0x2b7   :  { %1965 = vsyncadd [#allocation4], 4294967040 }
 0x2b8   :  { %1689 = vsyncpa [#allocation3], 1 }
 0x2b9   :  { %1690 = vsyncpa [#allocation4], 1 }

</bundles_post_ra>
